<compile_context>
chip_gen: v5e
topology: v5e:2x2
jax: 0.10.0
libtpu: 0.0.40
codegen_flags: <defaults>
</compile_context>

<pallas_src>
import functools

import numpy as np
import jax
import jax.numpy as jnp
from jax.experimental import pallas as pl
from jax.experimental.pallas import tpu as pltpu


_MODEL_STAGE_DEPTH = {50: (3, 4, 6, 3), 101: (3, 4, 23, 3)}
_TEMPORAL_KERNEL_BASIS_SLOWFAST = [[[1], [5]], [[1], [3]], [[1], [3]], [[3], [3]], [[3], [3]]]
# _POOL1['slowfast'] == [[1,1,1],[1,1,1]]  ->  pathway max-pools are identity.

CFG = dict(
    DEPTH=50,
    NUM_GROUPS=1,
    WIDTH_PER_GROUP=64,      # SlowFast._construct_network hardcodes width_per_group = 64
    BETA_INV=8,
    ALPHA=4,
    FUSION_CONV_CHANNEL_RATIO=2,
    FUSION_KERNEL_SZ=5,
    SPATIAL_STRIDES=[[1, 1], [2, 2], [2, 2], [2, 2]],
    NUM_CLASSES=10,
    BN_EPS=1e-5,
)


def _ceil_to(x, m):
    return (x + m - 1) // m * m


def _cdiv(a, b):
    return -(-a // b)


def _cparams(dims=None, vmem_bytes=16 * 1024 * 1024):
    # Budget well under v7x's 64 MiB physical VMEM; leaves headroom for double-buffered
    # BlockSpec pipelining on every generation (v5e/v6e have 128 MiB).
    return pltpu.CompilerParams(dimension_semantics=dims,
                                vmem_limit_bytes=int(vmem_bytes))


# ----------------------------- tiled matmul + BN/activation (+residual) -----------------------------

def _mm_kernel(a_ref, b_ref, s_ref, t_ref, *rest, act, has_res):
    """acc += A_blk @ B_blk (bf16 MXU, f32 acc); last-K epilogue:
    out = act(acc * scale + bias [+ residual]) with scale/bias per output column."""
    if has_res:
        r_ref, o_ref, acc_ref = rest
    else:
        r_ref = None
        o_ref, acc_ref = rest

    @pl.when(pl.program_id(2) == 0)
    def _():
        acc_ref[...] = jnp.zeros_like(acc_ref)

    a = a_ref[...].astype(jnp.bfloat16)     # no-op if the wrapper already produced bf16
    acc_ref[...] += jnp.dot(a, b_ref[...], preferred_element_type=jnp.float32)

    @pl.when(pl.program_id(2) == pl.num_programs(2) - 1)
    def _():
        out = acc_ref[...] * s_ref[...] + t_ref[...]
        if has_res:
            out = out + r_ref[...]
        if act == "relu":
            out = jnp.maximum(out, 0.0)
        elif act == "softmax":
            out = jax.nn.softmax(out, axis=-1)
        o_ref[...] = out.astype(o_ref.dtype)


def _pick_tiles(M, N, K):
    """Tile sizes that minimize zero padding while staying (8,128)-legal."""
    # rows (sublanes): a single full-dim tile if it fits, else ~512 rows with minimal padding
    if M <= 512:
        tm, Mp = M, M
    else:
        nm = _cdiv(M, 512)
        tm = _ceil_to(_cdiv(M, nm), 8)
        Mp = tm * nm
    # reduction: one full-dim step up to 768, else multiple-of-128 chunks minimizing padding
    if K <= 768:
        tk, Kp = K, K
    else:
        best = None
        for nk in range(_cdiv(K, 512), _cdiv(K, 128) + 1):
            tk_c = _ceil_to(_cdiv(K, nk), 128)
            cand = (tk_c * nk, nk, tk_c)
            if best is None or cand < best:
                best = cand
        Kp, _, tk = best
    # output columns (lanes): narrow Cout kept un-padded (full-dim block), otherwise 128-aligned
    if N < 128:
        tn, Np = N, N
    else:
        Np = _ceil_to(N, 128)
        nn = _cdiv(Np, 512)
        tn = _ceil_to(_cdiv(Np, nn), 128)
        Np = tn * _cdiv(Np, tn)
        # v7x has 2 TensorCores sharing the grid: make sure >=2 parallel blocks exist.
        if Mp // tm == 1 and Np // tn == 1 and Np >= 256:
            tn = Np // 2
    return tm, tn, tk, Mp, Np, Kp


def _mm_vmem_bytes(tm, tn, tk, a_bytes, has_res):
    per_step = tm * tk * a_bytes + tk * tn * 2 + 2 * tn * 4 + (tm * tn * 4 if has_res else 0)
    out_acc = 3 * tm * tn * 4      # double-buffered output + accumulator
    need = 2 * per_step + out_acc
    return min(48 * 1024 * 1024, max(20 * 1024 * 1024, 2 * need))


def matmul_affine(a, b, scale, bias, act="none", residual=None):
    """out = act((A @ B) * scale + bias [+ residual]), tiled over (M, N, K)."""
    M, K = a.shape
    K2, N = b.shape
    assert K == K2
    tm, tn, tk, Mp, Np, Kp = _pick_tiles(M, N, K)
    grid = (Mp // tm, Np // tn, Kp // tk)
    if act == "softmax":
        assert grid[1] == 1 and Np == N, "softmax epilogue requires a single unpadded N tile"

    a_p = a
    if a_p.dtype != jnp.bfloat16 and grid[1] > 2:
        # A is re-streamed >2x: a one-time bf16 cast pays for itself in HBM traffic.
        a_p = a_p.astype(jnp.bfloat16)
    if (Mp, Kp) != (M, K):
        a_p = jnp.pad(a_p, ((0, Mp - M), (0, Kp - K)))

    b_p = b.astype(jnp.bfloat16)
    if (Kp, Np) != (K, N):
        b_p = jnp.pad(b_p, ((0, Kp - K), (0, Np - N)))

    s_p = scale.astype(jnp.float32).reshape(1, N)
    t_p = bias.astype(jnp.float32).reshape(1, N)
    if Np != N:
        s_p = jnp.pad(s_p, ((0, 0), (0, Np - N)), constant_values=1.0)
        t_p = jnp.pad(t_p, ((0, 0), (0, Np - N)), constant_values=0.0)

    in_specs = [
        pl.BlockSpec((tm, tk), lambda i, j, k: (i, k)),
        pl.BlockSpec((tk, tn), lambda i, j, k: (k, j)),
        pl.BlockSpec((1, tn), lambda i, j, k: (0, j)),
        pl.BlockSpec((1, tn), lambda i, j, k: (0, j)),
    ]
    operands = [a_p, b_p, s_p, t_p]

    has_res = residual is not None
    if has_res:
        r_p = residual.astype(jnp.float32)
        if (Mp, Np) != (M, N):
            r_p = jnp.pad(r_p, ((0, Mp - M), (0, Np - N)))
        in_specs.append(pl.BlockSpec((tm, tn), lambda i, j, k: (i, j)))
        operands.append(r_p)

    a_bytes = 2 if a_p.dtype == jnp.bfloat16 else 4
    out = pl.pallas_call(
        functools.partial(_mm_kernel, act=act, has_res=has_res),
        out_shape=jax.ShapeDtypeStruct((Mp, Np), jnp.float32),
        grid=grid,
        in_specs=in_specs,
        out_specs=pl.BlockSpec((tm, tn), lambda i, j, k: (i, j)),
        scratch_shapes=[pltpu.VMEM((tm, tn), jnp.float32)],
        compiler_params=_cparams(("parallel", "parallel", "arbitrary"),
                                 _mm_vmem_bytes(tm, tn, tk, a_bytes, has_res)),
    )(*operands)
    if (Mp, Np) != (M, N):
        out = out[:M, :N]
    return out


# ----------------------------- conv / pool wrappers (channels-last) -----------------------------

def conv3d_bn_act(x, w, scale, bias, stride, padding, act="relu", residual=None):
    """Conv3d (bias=False) + folded BatchNorm3d + activation (+ fused residual add+ReLU)
    via the tiled Pallas matmul.  x is NDHWC; 1x1x1 convs are a free reshape."""
    N, D, H, W, C = x.shape
    Cout, Cin, kt, kh, kw = w.shape
    assert Cin == C
    st, sh, sw = stride
    pt, ph, pw = padding
    Do = (D + 2 * pt - kt) // st + 1
    Ho = (H + 2 * ph - kh) // sh + 1
    Wo = (W + 2 * pw - kw) // sw + 1
    M = N * Do * Ho * Wo

    if (kt, kh, kw) == (1, 1, 1):
        assert (pt, ph, pw) == (0, 0, 0)
        xs = x if (st, sh, sw) == (1, 1, 1) else x[:, ::st, ::sh, ::sw, :]
        a = xs.reshape(M, C)                       # channels-last: no transpose needed
        wmat = w.reshape(Cout, Cin).T
    else:
        # TODO(synk): fold the kernel-tap reduction into the Pallas K grid (manual DMA of
        # shifted windows) instead of materializing bf16 im2col patches in HBM.
        xp = x.astype(jnp.bfloat16)
        if (pt, ph, pw) != (0, 0, 0):
            xp = jnp.pad(xp, ((0, 0), (pt, pt), (ph, ph), (pw, pw), (0, 0)))
        cols = []
        for it in range(kt):
            for ih in range(kh):
                for iw in range(kw):
                    cols.append(xp[:,
                                   it:it + st * (Do - 1) + 1:st,
                                   ih:ih + sh * (Ho - 1) + 1:sh,
                                   iw:iw + sw * (Wo - 1) + 1:sw, :])
        a = jnp.stack(cols, axis=4).reshape(M, kt * kh * kw * C)
        wmat = w.transpose(0, 2, 3, 4, 1).reshape(Cout, kt * kh * kw * Cin).T

    res = residual.reshape(M, Cout) if residual is not None else None
    out = matmul_affine(a, wmat, scale, bias, act=act, residual=res)
    return out.reshape(N, Do, Ho, Wo, Cout)


def _maxpool_kernel(x_ref, o_ref, *, Ho, Wo, C):
    """Separable 3x3 / stride-2 max on one padded (Hp, Wo+1, 2C) slab (W pairs merged on lanes)."""
    blk = x_ref[0]                                      # (Hp, Wo+1, 2C)
    a = blk[:, 0:Wo, :]                                 # columns 2w, 2w+1
    b = blk[:, 1:Wo + 1, 0:C]                           # column  2w+2
    colmax = jnp.maximum(jnp.maximum(a[:, :, 0:C], a[:, :, C:2 * C]), b)   # (Hp, Wo, C)
    cm = colmax.reshape(Ho + 1, 2, Wo, C)
    out = jnp.maximum(jnp.maximum(cm[0:Ho, 0], cm[0:Ho, 1]), cm[1:Ho + 1, 0])
    o_ref[0] = out


def maxpool3d_1x3x3_s2(x):
    """MaxPool3d(kernel=[1,3,3], stride=[1,2,2], padding=[0,1,1]) from ResNetBasicStem (NDHWC)."""
    N, D, H, W, C = x.shape
    assert H % 2 == 0 and W % 2 == 0
    Ho, Wo = H // 2, W // 2
    Hp = H + 2
    xp = jnp.pad(x, ((0, 0), (0, 0), (1, 1), (1, 1), (0, 0)), constant_values=-jnp.inf)
    xr = xp.reshape(N * D, Hp, Wo + 1, 2 * C)           # free reshape (merges W pairs into lanes)
    out = pl.pallas_call(
        functools.partial(_maxpool_kernel, Ho=Ho, Wo=Wo, C=C),
        out_shape=jax.ShapeDtypeStruct((N * D, Ho, Wo, C), jnp.float32),
        grid=(N * D,),
        in_specs=[pl.BlockSpec((1, Hp, Wo + 1, 2 * C), lambda i: (i, 0, 0, 0))],
        out_specs=pl.BlockSpec((1, Ho, Wo, C), lambda i: (i, 0, 0, 0)),
        compiler_params=_cparams(("parallel",), 32 * 1024 * 1024),
    )(xr)
    return out.reshape(N, D, Ho, Wo, C)


def _gap_kernel(x_ref, o_ref, acc_ref, *, inv):
    @pl.when(pl.program_id(1) == 0)
    def _():
        acc_ref[...] = jnp.zeros_like(acc_ref)

    acc_ref[...] += jnp.sum(x_ref[...], axis=1, keepdims=True)

    @pl.when(pl.program_id(1) == pl.num_programs(1) - 1)
    def _():
        o_ref[...] = acc_ref[...] * inv


def global_avg_pool(x):
    """Global average pool over D*H*W; channels stay on the lane dimension (NDHWC input)."""
    N, D, H, W, C = x.shape
    dhw = D * H * W
    x2 = x.reshape(N, dhw, C)
    if dhw <= 2048:
        chunk, dhwp = dhw, dhw
    else:
        nch = _cdiv(dhw, 2048)
        chunk = _ceil_to(_cdiv(dhw, nch), 8)
        dhwp = chunk * nch
        x2 = jnp.pad(x2, ((0, 0), (0, dhwp - dhw), (0, 0)))
    out = pl.pallas_call(
        functools.partial(_gap_kernel, inv=1.0 / dhw),
        out_shape=jax.ShapeDtypeStruct((N, 1, C), jnp.float32),
        grid=(N, dhwp // chunk),
        in_specs=[pl.BlockSpec((1, chunk, C), lambda n, j: (n, j, 0))],
        out_specs=pl.BlockSpec((1, 1, C), lambda n, j: (n, 0, 0)),
        scratch_shapes=[pltpu.VMEM((1, 1, C), jnp.float32)],
        compiler_params=_cparams(("parallel", "arbitrary")),
    )(x2)
    return out.reshape(N, C)


# ----------------------------- parameters -----------------------------

class ParamGen:
    def __init__(self, seed):
        self.base = jax.random.PRNGKey(seed)
        self.count = 0

    def key(self):
        self.count += 1
        return jax.random.fold_in(self.base, self.count)

    def conv_w(self, cout, cin, kt, kh, kw):
        fan_in = cin * kt * kh * kw
        return jax.random.normal(self.key(), (cout, cin, kt, kh, kw),
                                 jnp.float32) * np.float32(np.sqrt(2.0 / fan_in))

    def bn(self, c, eps=1e-5):
        # Deterministic synthetic BatchNorm3d (inference mode) folded to (scale, bias).
        gamma = 1.0 + 0.1 * jax.random.normal(self.key(), (c,), jnp.float32)
        beta = 0.1 * jax.random.normal(self.key(), (c,), jnp.float32)
        mean = 0.1 * jax.random.normal(self.key(), (c,), jnp.float32)
        var = jnp.abs(1.0 + 0.1 * jax.random.normal(self.key(), (c,), jnp.float32))
        scale = gamma * jax.lax.rsqrt(var + eps)
        bias = beta - mean * scale
        return scale, bias


def build_params(cfg, seed=0):
    pg = ParamGen(seed)
    w = 64
    beta = cfg['BETA_INV']
    ratio = cfg['FUSION_CONV_CHANNEL_RATIO']
    fk = cfg['FUSION_KERNEL_SZ']
    out_dim_ratio = beta // ratio
    dim_inner = cfg['NUM_GROUPS'] * w
    d2, d3, d4, d5 = _MODEL_STAGE_DEPTH[cfg['DEPTH']]
    tks = _TEMPORAL_KERNEL_BASIS_SLOWFAST
    eps = cfg['BN_EPS']

    params = {}
    # s1: VideoModelStem — per-pathway conv([t,7,7], stride [1,2,2]) + bn + relu + maxpool
    params['s1'] = [
        dict(w=pg.conv_w(w, 3, tks[0][0][0], 7, 7), bn=pg.bn(w, eps)),
        dict(w=pg.conv_w(w // beta, 3, tks[0][1][0], 7, 7), bn=pg.bn(w // beta, eps)),
    ]

    def fuse_params(c_fast):
        return dict(w=pg.conv_w(c_fast * ratio, c_fast, fk, 1, 1),
                    bn=pg.bn(c_fast * ratio, eps), fk=fk)

    def stage_params(dim_in, dim_out, dinner, temp_kernel_sizes, num_blocks, strides):
        stage = []
        for p in range(2):
            blocks, din = [], dim_in[p]
            for i in range(num_blocks[p]):
                tk = temp_kernel_sizes[p][i % len(temp_kernel_sizes[p])]
                st = strides[p] if i == 0 else 1
                blk = dict(
                    tk=tk, stride=st,
                    wa=pg.conv_w(dinner[p], din, tk, 1, 1), bna=pg.bn(dinner[p], eps),
                    wb=pg.conv_w(dinner[p], dinner[p], 1, 3, 3), bnb=pg.bn(dinner[p], eps),
                    wc=pg.conv_w(dim_out[p], dinner[p], 1, 1, 1), bnc=pg.bn(dim_out[p], eps),
                )
                if din != dim_out[p] or st != 1:
                    blk['w_short'] = pg.conv_w(dim_out[p], din, 1, 1, 1)
                    blk['bn_short'] = pg.bn(dim_out[p], eps)
                blocks.append(blk)
                din = dim_out[p]
            stage.append(blocks)
        return stage

    ss = cfg['SPATIAL_STRIDES']
    params['s1_fuse'] = fuse_params(w // beta)
    params['s2'] = stage_params([w + w // out_dim_ratio, w // beta],
                                [w * 4, w * 4 // beta],
                                [dim_inner, dim_inner // beta],
                                tks[1], [d2, d2], ss[0])
    params['s2_fuse'] = fuse_params(w * 4 // beta)
    params['s3'] = stage_params([w * 4 + w * 4 // out_dim_ratio, w * 4 // beta],
                                [w * 8, w * 8 // beta],
                                [dim_inner * 2, dim_inner * 2 // beta],
                                tks[2], [d3, d3], ss[1])
    params['s3_fuse'] = fuse_params(w * 8 // beta)
    params['s4'] = stage_params([w * 8 + w * 8 // out_dim_ratio, w * 8 // beta],
                                [w * 16, w * 16 // beta],
                                [dim_inner * 4, dim_inner * 4 // beta],
                                tks[3], [d4, d4], ss[2])
    params['s4_fuse'] = fuse_params(w * 16 // beta)
    params['s5'] = stage_params([w * 16 + w * 16 // out_dim_ratio, w * 16 // beta],
                                [w * 32, w * 32 // beta],
                                [dim_inner * 8, dim_inner * 8 // beta],
                                tks[4], [d5, d5], ss[3])

    head_in = w * 32 + w * 32 // beta   # 2048 + 256
    nc = cfg['NUM_CLASSES']
    params['head'] = dict(
        w=0.01 * jax.random.normal(pg.key(), (head_in, nc), jnp.float32),  # FC_INIT_STD=0.01
        scale=jnp.ones((nc,), jnp.float32),
        bias=jnp.zeros((nc,), jnp.float32),
    )
    return params


# ----------------------------- model forward (channels-last) -----------------------------

def stem_pathway(x, p):
    scale, bias = p['bn']
    tk = p['w'].shape[2]
    x = conv3d_bn_act(x, p['w'], scale, bias,
                      stride=(1, 2, 2), padding=(tk // 2, 3, 3), act='relu')
    return maxpool3d_1x3x3_s2(x)


def fuse_fast_to_slow(x_s, x_f, p, alpha):
    scale, bias = p['bn']
    fuse = conv3d_bn_act(x_f, p['w'], scale, bias,
                         stride=(alpha, 1, 1), padding=(p['fk'] // 2, 0, 0), act='relu')
    return jnp.concatenate([x_s, fuse], axis=-1), x_f


def res_block(x, p):
    st = p['stride']
    if 'w_short' in p:
        s_s, b_s = p['bn_short']
        shortcut = conv3d_bn_act(x, p['w_short'], s_s, b_s,
                                 stride=(1, st, st), padding=(0, 0, 0), act='none')
    else:
        shortcut = x
    sa, ba = p['bna']
    sb, bb = p['bnb']
    sc, bc = p['bnc']
    h = conv3d_bn_act(x, p['wa'], sa, ba, stride=(1, 1, 1),
                      padding=(p['tk'] // 2, 0, 0), act='relu')
    h = conv3d_bn_act(h, p['wb'], sb, bb, stride=(1, st, st),
                      padding=(0, 1, 1), act='relu')
    # Residual add + ReLU fused into the wc conv's matmul epilogue.
    h = conv3d_bn_act(h, p['wc'], sc, bc, stride=(1, 1, 1),
                      padding=(0, 0, 0), act='relu', residual=shortcut)
    return h


def run_stage(x, blocks):
    for blk in blocks:
        x = res_block(x, blk)
    return x


def basic_head(x_s, x_f, p):
    # TODO(synk): head_helper.BasicHead internals (dim_inner=512 projection, dropout) are not
    # available; implemented as global avg-pool per pathway + concat + linear + softmax (eval).
    gs = global_avg_pool(x_s)
    gf = global_avg_pool(x_f)
    feat = jnp.concatenate([gs, gf], axis=1)
    return matmul_affine(feat, p['w'], p['scale'], p['bias'], act='softmax')


def slowfast_forward(params, x_slow, x_fast, cfg):
    alpha = cfg['ALPHA']
    # Single NCDHW -> NDHWC conversion at the boundary; everything below stays channels-last.
    xs = jnp.transpose(x_slow, (0, 2, 3, 4, 1))
    xf = jnp.transpose(x_fast, (0, 2, 3, 4, 1))
    xs = stem_pathway(xs, params['s1'][0])
    xf = stem_pathway(xf, params['s1'][1])
    xs, xf = fuse_fast_to_slow(xs, xf, params['s1_fuse'], alpha)
    xs = run_stage(xs, params['s2'][0])
    xf = run_stage(xf, params['s2'][1])
    xs, xf = fuse_fast_to_slow(xs, xf, params['s2_fuse'], alpha)
    # pathway{0,1}_pool: MaxPool3d(kernel=[1,1,1], stride=[1,1,1]) is identity for 'slowfast'.
    xs = run_stage(xs, params['s3'][0])
    xf = run_stage(xf, params['s3'][1])
    xs, xf = fuse_fast_to_slow(xs, xf, params['s3_fuse'], alpha)
    xs = run_stage(xs, params['s4'][0])
    xf = run_stage(xf, params['s4'][1])
    xs, xf = fuse_fast_to_slow(xs, xf, params['s4_fuse'], alpha)
    xs = run_stage(xs, params['s5'][0])
    xf = run_stage(xf, params['s5'][1])
    return basic_head(xs, xf, params['head'])


# ----------------------------- main -----------------------------

if __name__ == "__main__":
    key = jax.random.PRNGKey(0)
    k_slow, k_fast = jax.random.split(key)
    N = 1
    T_fast = 8
    T_slow = T_fast // CFG['ALPHA']   # 2
    H = W = 32
    x_slow = jax.random.normal(k_slow, (N, 3, T_slow, H, W), jnp.float32)
    x_fast = jax.random.normal(k_fast, (N, 3, T_fast, H, W), jnp.float32)

    params = build_params(CFG, seed=0)
    out = slowfast_forward(params, x_slow, x_fast, CFG)
    out = jax.block_until_ready(out)

    assert out.shape == (N, CFG['NUM_CLASSES'])
    assert bool(jnp.all(jnp.isfinite(out)))
    # Softmax invariant (computed in f32 inside the epilogue): rows sum to 1.
    assert bool(jnp.all(jnp.abs(jnp.sum(out, axis=-1) - 1.0) < 1e-3))
    print("KERNEL_OK")
</pallas_src>

<mosaic_0001>
module attributes {stable_mosaic.version = 11 : i64} {
  func.func @_mm_kernel(%arg0: i32, %arg1: i32, %arg2: i32, %arg3: memref<512x147xbf16, #tpu.memory_space<vmem>>, %arg4: memref<147x64xbf16, #tpu.memory_space<vmem>>, %arg5: memref<1x64xf32, #tpu.memory_space<vmem>>, %arg6: memref<1x64xf32, #tpu.memory_space<vmem>>, %arg7: memref<512x64xf32, #tpu.memory_space<vmem>>, %arg8: memref<512x64xf32, #tpu.memory_space<vmem>>) attributes {dimension_semantics = [#tpu.dimension_semantics<parallel>, #tpu.dimension_semantics<parallel>, #tpu.dimension_semantics<arbitrary>], iteration_bounds = array<i64: 1, 1, 1>, scalar_prefetch = 0 : i64, scratch_operands = 1 : i64, tpu.core_type = #tpu.core_type<tc>, window_params = [{transform_indices = @transform_0, window_bounds = array<i64: 512, 147>}, {transform_indices = @transform_1, window_bounds = array<i64: 147, 64>}, {transform_indices = @transform_2, window_bounds = array<i64: 1, 64>}, {transform_indices = @transform_3, window_bounds = array<i64: 1, 64>}, {transform_indices = @transform_4, window_bounds = array<i64: 512, 64>}]} {
    %c0_i32 = arith.constant 0 : i32
    %0 = arith.cmpi eq, %arg2, %c0_i32 : i32
    %1 = arith.extui %0 : i1 to i32
    %c0_i32_0 = arith.constant 0 : i32
    %2 = arith.cmpi ne, %1, %c0_i32_0 : i32
    scf.if %2 {
      %cst_10 = arith.constant 0.000000e+00 : f32
      %12 = vector.broadcast %cst_10 : f32 to vector<512x64xf32>
      %c0_11 = arith.constant 0 : index
      %c0_12 = arith.constant 0 : index
      %13 = vector.load %arg8[%c0_11, %c0_12] : memref<512x64xf32, #tpu.memory_space<vmem>>, vector<512x64xf32>
      tpu.vector_store %arg8[%c0_11, %c0_12], %12 {strides = array<i32>} : memref<512x64xf32, #tpu.memory_space<vmem>>, vector<512x64xf32>,
    } else {
    }
    %c0 = arith.constant 0 : index
    %c0_1 = arith.constant 0 : index
    %3 = vector.load %arg3[%c0, %c0_1] : memref<512x147xbf16, #tpu.memory_space<vmem>>, vector<512x147xbf16>
    %c0_2 = arith.constant 0 : index
    %c0_3 = arith.constant 0 : index
    %4 = vector.load %arg8[%c0_2, %c0_3] : memref<512x64xf32, #tpu.memory_space<vmem>>, vector<512x64xf32>
    %c0_4 = arith.constant 0 : index
    %c0_5 = arith.constant 0 : index
    %5 = vector.load %arg4[%c0_4, %c0_5] : memref<147x64xbf16, #tpu.memory_space<vmem>>, vector<147x64xbf16>
    %cst = arith.constant dense<0.000000e+00> : vector<512x64xf32>
    %6 = tpu.matmul %3, %5, %cst {dimension_numbers = #tpu.dot_dimension_numbers<[1], [0], [0], [1], [0, 0, 1, 1], [], []>} : vector<512x147xbf16>, vector<147x64xbf16>, vector<512x64xf32> -> vector<512x64xf32>
    %7 = arith.addf %4, %6 : vector<512x64xf32>
    %c0_6 = arith.constant 0 : index
    %c0_7 = arith.constant 0 : index
    %8 = vector.load %arg8[%c0_6, %c0_7] : memref<512x64xf32, #tpu.memory_space<vmem>>, vector<512x64xf32>
    tpu.vector_store %arg8[%c0_6, %c0_7], %7 {strides = array<i32>} : memref<512x64xf32, #tpu.memory_space<vmem>>, vector<512x64xf32>,
    %c0_i32_8 = arith.constant 0 : i32
    %9 = arith.cmpi eq, %arg2, %c0_i32_8 : i32
    %10 = arith.extui %9 : i1 to i32
    %c0_i32_9 = arith.constant 0 : i32
    %11 = arith.cmpi ne, %10, %c0_i32_9 : i32
    scf.if %11 {
      %c0_10 = arith.constant 0 : index
      %c0_11 = arith.constant 0 : index
      %12 = vector.load %arg8[%c0_10, %c0_11] : memref<512x64xf32, #tpu.memory_space<vmem>>, vector<512x64xf32>
      %c0_12 = arith.constant 0 : index
      %c0_13 = arith.constant 0 : index
      %13 = vector.load %arg5[%c0_12, %c0_13] : memref<1x64xf32, #tpu.memory_space<vmem>>, vector<1x64xf32>
      %14 = vector.broadcast %13 : vector<1x64xf32> to vector<512x64xf32>
      %15 = arith.mulf %12, %14 : vector<512x64xf32>
      %c0_14 = arith.constant 0 : index
      %c0_15 = arith.constant 0 : index
      %16 = vector.load %arg6[%c0_14, %c0_15] : memref<1x64xf32, #tpu.memory_space<vmem>>, vector<1x64xf32>
      %17 = vector.broadcast %16 : vector<1x64xf32> to vector<512x64xf32>
      %18 = arith.addf %15, %17 : vector<512x64xf32>
      %cst_16 = arith.constant 0.000000e+00 : f32
      %19 = vector.broadcast %cst_16 : f32 to vector<512x64xf32>
      %20 = arith.maximumf %18, %19 : vector<512x64xf32>
      %c0_17 = arith.constant 0 : index
      %c0_18 = arith.constant 0 : index
      %21 = vector.load %arg7[%c0_17, %c0_18] : memref<512x64xf32, #tpu.memory_space<vmem>>, vector<512x64xf32>
      tpu.vector_store %arg7[%c0_17, %c0_18], %20 {strides = array<i32>} : memref<512x64xf32, #tpu.memory_space<vmem>>, vector<512x64xf32>,
    } else {
    }
    return
  }
  func.func @transform_0(%arg0: i32, %arg1: i32, %arg2: i32) -> (i32, i32) {
    %c0_i32 = arith.constant 0 : i32
    return %arg0, %arg2 : i32, i32
  }
  func.func @transform_1(%arg0: i32, %arg1: i32, %arg2: i32) -> (i32, i32) {
    %c0_i32 = arith.constant 0 : i32
    return %arg2, %arg1 : i32, i32
  }
  func.func @transform_2(%arg0: i32, %arg1: i32, %arg2: i32) -> (i32, i32) {
    %c0_i32 = arith.constant 0 : i32
    %c0_i32_0 = arith.constant 0 : i32
    return %c0_i32, %arg1 : i32, i32
  }
  func.func @transform_3(%arg0: i32, %arg1: i32, %arg2: i32) -> (i32, i32) {
    %c0_i32 = arith.constant 0 : i32
    %c0_i32_0 = arith.constant 0 : i32
    return %c0_i32, %arg1 : i32, i32
  }
  func.func @transform_4(%arg0: i32, %arg1: i32, %arg2: i32) -> (i32, i32) {
    %c0_i32 = arith.constant 0 : i32
    return %arg0, %arg1 : i32, i32
  }
}

</mosaic_0001>

<bundles_post_ra>
// kernel: tpu_custom_call.1
= control target key start
LH: loop header
LB: loop body
LE: loop exit
PB: predicated region body
PF: predicated region fallthrough
CT: control target
= control target key end

     0   :  { %vm676_vm0 = vcmask 1040384   ;;  %vm677_vm1 = vcmask 1041408   ;;  %v1898_v2 = vmov 65535   ;;  %vm579_vm2 = vcmask 154624   ;;  %s3075_s1 = inlined_call_operand.vmem [shape: bf16[147,64], index: 1, kind: input, shape index: {}]   ;;  %s3076_s0 = inlined_call_operand.vmem [shape: bf16[512,147], index: 0, kind: input, shape index: {}]   ;;  %s3077_s2 = inlined_call_operand.vmem [shape: f32[1,64], index: 2, kind: input, shape index: {}]   ;;  %s3078_s3 = inlined_call_operand.vmem [shape: f32[1,64], index: 3, kind: input, shape index: {}]   ;;  %s3079_s4 = inlined_call_operand.vmem [shape: f32[512,64], index: 4, kind: output, shape index: {}]  }
   0x1   :  { %v1880_v0 = vld [vmem:[%s3075_s1 + $0x38] sm:$0xff]  ;;  %v233_v1 = vld [vmem:[%s3075_s1 + $0x48] sm:$0x3]  ;;  %v678_v3 = vsel %vm676_vm0, 4294967295, %v1898_v2  ;;  %v1879_v5 = vld [vmem:[%s3075_s1 + $0x30] sm:$0xff]  ;;  %vm22_vm3 = vcmask 523264  }
   0x2   :  { %v559_v4 = vunpack.c.l.b16 %v233_v1  ;;  %683 = vmatpush.bf16.msra.mxu0 %v1880_v0  ;;  %1882 = vmatpush.bf16.msra.mxu2 %v1880_v0  ;;  %v679_v6 = vsel %vm677_vm1, %v678_v3, 0  ;;  %v1878_v9 = vld [vmem:[%s3075_s1 + $0x28] sm:$0xff]  ;;  %v1881_v10 = vld [vmem:[%s3075_s1 + $0x40] sm:$0xff]  ;;  %v1843_v13 = vld [vmem:[%s3076_s0 + $0x114] sm:$0xf] }
   0x3   :  { %v1809_v11 = vld [vmem:[%s3076_s0 + $0x4] sm:$0xf]  ;;  %v1489_v12 = vld [vmem:[%s3076_s0 + $0x8] sm:$0xf0]  ;;  %v1625_v14 = vld [vmem:[%s3076_s0 + $0x118] sm:$0xf0] }
   0x4   :  { %v569_v7 = vpack.c.b16 %v559_v4, %v559_v4  ;;  %v1492_v15 = vor.u32 %v1809_v11, %v1489_v12  ;;  %v1877_v16 = vld [vmem:[%s3075_s1 + $0x20] sm:$0xff]  ;;  %v1628_v17 = vor.u32 %v1843_v13, %v1625_v14  ;;  %v1876_v18 = vld [vmem:[%s3075_s1 + $0x18] sm:$0xff]  ;;  %v1875_v19 = vld [vmem:[%s3075_s1 + $0x10] sm:$0xff] }
   0x5   :  { %v1874_v20 = vld [vmem:[%s3075_s1 + $0x8] sm:$0xff]  ;;  %v1811_v21 = vld [vmem:[%s3076_s0 + $0x14] sm:$0xf]  ;;  %v1497_v22 = vld [vmem:[%s3076_s0 + $0x18] sm:$0xf0] }
   0x6   :  { %v681_v8 = vand.u32 %v679_v6, %v569_v7  ;;  %684 = vmatpush.bf16.msra.mxu0 %v1879_v5  ;;  %1883 = vmatpush.bf16.msra.mxu2 %v1879_v5  ;;  %v1845_v23 = vld [vmem:[%s3076_s0 + $0x124] sm:$0xf]  ;;  %v1633_v24 = vld [vmem:[%s3076_s0 + $0x128] sm:$0xf0]  ;;  %v1500_v25 = vor.u32 %v1811_v21, %v1497_v22  ;;  %v1487_v27 = vld [vmem:[%s3076_s0] sm:$0xf] }
   0x7   :  { %v1873_v26 = vld [vmem:[%s3075_s1] sm:$0xff]  ;;  %v1810_v28 = vld [vmem:[%s3076_s0 + $0x4] sm:$0xf0]  ;;  %v1636_v31 = vor.u32 %v1845_v23, %v1633_v24  ;;  %v1505_v35 = vld [vmem:[%s3076_s0 + $0x28] sm:$0xf0] }
   0x8   :  { %858 = vmatpush.bf16.msra.mxu1 %v681_v8  ;;  %1890 = vmatpush.bf16.msra.mxu3 %v681_v8  ;;  %v1615_v29 = vld [vmem:[%s3076_s0 + $0x100] sm:$0xf]  ;;  %v1842_v30 = vld [vmem:[%s3076_s0 + $0x104] sm:$0xf0]  ;;  %v1488_v32 = vor.u32 %v1810_v28, %v1487_v27  ;;  %v1813_v34 = vld [vmem:[%s3076_s0 + $0x24] sm:$0xf] }
   0x9   :  { %v1616_v33 = vor.u32 %v1842_v30, %v1615_v29  ;;  %v1847_v36 = vld [vmem:[%s3076_s0 + $0x134] sm:$0xf]  ;;  %v1641_v37 = vld [vmem:[%s3076_s0 + $0x138] sm:$0xf0]  ;;  %v1508_v38 = vor.u32 %v1813_v34, %v1505_v35  ;;  %v1495_v39 = vld [vmem:[%s3076_s0 + $0x10] sm:$0xf] }
   0xa   :  { %685 = vmatpush.bf16.msra.mxu0 %v1878_v9  ;;  %1884 = vmatpush.bf16.msra.mxu2 %v1878_v9  ;;  %v1812_v40 = vld [vmem:[%s3076_s0 + $0x14] sm:$0xf0]  ;;  %v1623_v41 = vld [vmem:[%s3076_s0 + $0x110] sm:$0xf]  ;;  %v1644_v43 = vor.u32 %v1847_v36, %v1641_v37  ;;  %v1815_v46 = vld [vmem:[%s3076_s0 + $0x34] sm:$0xf] }
   0xb   :  { %v1844_v42 = vld [vmem:[%s3076_s0 + $0x114] sm:$0xf0]  ;;  %v1496_v44 = vor.u32 %v1812_v40, %v1495_v39  ;;  %v1513_v47 = vld [vmem:[%s3076_s0 + $0x38] sm:$0xf0]  ;;  %v1849_v48 = vld [vmem:[%s3076_s0 + $0x144] sm:$0xf] }
   0xc   :  { %859 = vmatpush.bf16.msra.mxu1 %v1881_v10  ;;  %1891 = vmatpush.bf16.msra.mxu3 %v1881_v10  ;;  %v1624_v45 = vor.u32 %v1844_v42, %v1623_v41  ;;  %v1649_v49 = vld [vmem:[%s3076_s0 + $0x148] sm:$0xf0]  ;;  %v1516_v50 = vor.u32 %v1815_v46, %v1513_v47  ;;  %v1503_v51 = vld [vmem:[%s3076_s0 + $0x20] sm:$0xf]  ;;  %v1814_v52 = vld [vmem:[%s3076_s0 + $0x24] sm:$0xf0] }
   0xd   :  { %v1631_v53 = vld [vmem:[%s3076_s0 + $0x120] sm:$0xf]  ;;  %v1846_v54 = vld [vmem:[%s3076_s0 + $0x124] sm:$0xf0]  ;;  %v1652_v55 = vor.u32 %v1849_v48, %v1649_v49  ;;  %v1504_v56 = vor.u32 %v1814_v52, %v1503_v51  ;;  %v1817_v58 = vld [vmem:[%s3076_s0 + $0x44] sm:$0xf] }
   0xe   :  { %686 = vmatpush.bf16.msra.mxu0 %v1877_v16  ;;  %1885 = vmatpush.bf16.msra.mxu2 %v1877_v16  ;;  %v1632_v57 = vor.u32 %v1846_v54, %v1631_v53  ;;  %v1521_v59 = vld [vmem:[%s3076_s0 + $0x48] sm:$0xf0]  ;;  %v1851_v60 = vld [vmem:[%s3076_s0 + $0x154] sm:$0xf]  ;;  %v1657_v61 = vld [vmem:[%s3076_s0 + $0x158] sm:$0xf0] }
   0xf   :  { %1777 = vmatmul.msk.bf16.vlgmr.msra.gmra.mxu1 %vm579_vm2, %v1492_v15  ;;  %1794 = vmatmul.msk.bf16.vlgmr.msra.gmra.mxu3 %vm579_vm2, %v1628_v17  ;;  %v1524_v62 = vor.u32 %v1817_v58, %v1521_v59  ;;  %v1511_v63 = vld [vmem:[%s3076_s0 + $0x30] sm:$0xf]  ;;  %v1816_v0 = vld [vmem:[%s3076_s0 + $0x34] sm:$0xf0]  ;;  %v1660_v3 = vor.u32 %v1851_v60, %v1657_v61  ;;  %v1819_v6 = vld [vmem:[%s3076_s0 + $0x54] sm:$0xf] }
  0x10   :  { %v1639_v1 = vld [vmem:[%s3076_s0 + $0x130] sm:$0xf]  ;;  %v1848_v2 = vld [vmem:[%s3076_s0 + $0x134] sm:$0xf0]  ;;  %v1512_v4 = vor.u32 %v1816_v0, %v1511_v63  ;;  %v1529_v7 = vld [vmem:[%s3076_s0 + $0x58] sm:$0xf0] }
  0x11   :  { %v1640_v5 = vor.u32 %v1848_v2, %v1639_v1  ;;  %v1853_v8 = vld [vmem:[%s3076_s0 + $0x164] sm:$0xf]  ;;  %v1665_v9 = vld [vmem:[%s3076_s0 + $0x168] sm:$0xf0]  ;;  %v1532_v10 = vor.u32 %v1819_v6, %v1529_v7  ;;  %v1519_v11 = vld [vmem:[%s3076_s0 + $0x40] sm:$0xf] }
  0x12   :  { %687 = vmatpush.bf16.msra.mxu0 %v1876_v18  ;;  %1886 = vmatpush.bf16.msra.mxu2 %v1876_v18  ;;  %v1818_v12 = vld [vmem:[%s3076_s0 + $0x44] sm:$0xf0]  ;;  %v1647_v13 = vld [vmem:[%s3076_s0 + $0x140] sm:$0xf]  ;;  %v1668_v15 = vor.u32 %v1853_v8, %v1665_v9  ;;  %v1821_v18 = vld [vmem:[%s3076_s0 + $0x64] sm:$0xf] }
  0x13   :  { %v1850_v14 = vld [vmem:[%s3076_s0 + $0x144] sm:$0xf0]  ;;  %v1520_v16 = vor.u32 %v1818_v12, %v1519_v11  ;;  %v1673_v21 = vld [vmem:[%s3076_s0 + $0x178] sm:$0xf0]  ;;  %v1527_v23 = vld [vmem:[%s3076_s0 + $0x50] sm:$0xf] }
  0x14   :  { %v1648_v17 = vor.u32 %v1850_v14, %v1647_v13  ;;  %v1820_v24 = vld [vmem:[%s3076_s0 + $0x54] sm:$0xf0]  ;;  %v1823_v30 = vld [vmem:[%s3076_s0 + $0x74] sm:$0xf]  ;;  %v1535_v35 = vld [vmem:[%s3076_s0 + $0x60] sm:$0xf] }
  0x15   :  { %v1528_v28 = vor.u32 %v1820_v24, %v1527_v23  ;;  %v1822_v36 = vld [vmem:[%s3076_s0 + $0x64] sm:$0xf0]  ;;  %v1899_v37 = vmov 0.0   ;;  %v1543_v46 = vld [vmem:[%s3076_s0 + $0x70] sm:$0xf] }
  0x16   :  { %688 = vmatpush.bf16.msra.mxu0 %v1875_v19  ;;  %1887 = vmatpush.bf16.msra.mxu2 %v1875_v19  ;;  %v1537_v19 = vld [vmem:[%s3076_s0 + $0x68] sm:$0xf0]  ;;  %23 = vst.msk [vmem:[#allocation2] sm:$0xff] %vm22_vm3, %v1899_v37  ;;  %v1854_v39 = vld [vmem:[%s3076_s0 + $0x164] sm:$0xf0]  ;;  %v1536_v41 = vor.u32 %v1822_v36, %v1535_v35 }
  0x17   :  { %v1540_v22 = vor.u32 %v1821_v18, %v1537_v19  ;;  %24 = vst.msk [vmem:[#allocation2 + $0x8] sm:$0xff] %vm22_vm3, %v1899_v37  ;;  %v1824_v47 = vld [vmem:[%s3076_s0 + $0x74] sm:$0xf0]  ;;  %v1671_v49 = vld [vmem:[%s3076_s0 + $0x170] sm:$0xf] }
  0x18   :  { %25 = vst.msk [vmem:[#allocation2 + $0x10] sm:$0xff] %vm22_vm3, %v1899_v37  ;;  %v1544_v51 = vor.u32 %v1824_v47, %v1543_v46  ;;  %v1827_v54 = vld [vmem:[%s3076_s0 + $0x94] sm:$0xf]  ;;  %v1551_v60 = vld [vmem:[%s3076_s0 + $0x80] sm:$0xf] }
  0x19   :  { %26 = vst.msk [vmem:[#allocation2 + $0x18] sm:$0xff] %vm22_vm3, %v1899_v37  ;;  %v1826_v61 = vld [vmem:[%s3076_s0 + $0x84] sm:$0xf0]  ;;  %v1679_v63 = vld [vmem:[%s3076_s0 + $0x180] sm:$0xf] }
  0x1a   :  { %689 = vmatpush.bf16.msra.mxu0 %v1874_v20  ;;  %1888 = vmatpush.bf16.msra.mxu2 %v1874_v20  ;;  %v1855_v20 = vld [vmem:[%s3076_s0 + $0x174] sm:$0xf]  ;;  %27 = vst.msk [vmem:[#allocation2 + $0x20] sm:$0xff] %vm22_vm3, %v1899_v37  ;;  %v1858_v0 = vld [vmem:[%s3076_s0 + $0x184] sm:$0xf0]  ;;  %v1552_v1 = vor.u32 %v1826_v61, %v1551_v60 }
  0x1b   :  { %v1676_v27 = vor.u32 %v1855_v20, %v1673_v21  ;;  %28 = vst.msk [vmem:[#allocation2 + $0x28] sm:$0xff] %vm22_vm3, %v1899_v37  ;;  %v2292_v9 = vld [vmem:[%s3077_s2] ss:$0 sm:$0xff]  ;;  %v1829_v13 = vld [vmem:[%s3076_s0 + $0xa4] sm:$0xf] }
  0x1c   :  { %29 = vst.msk [vmem:[#allocation2 + $0x30] sm:$0xff] %vm22_vm3, %v1899_v37  ;;  %v1569_v14 = vld [vmem:[%s3076_s0 + $0xa8] sm:$0xf0]  ;;  %v2321_v18 = vld [vmem:[%s3078_s3] ss:$0 sm:$0xff] }
  0x1d   :  { %30 = vst.msk [vmem:[#allocation2 + $0x38] sm:$0xff] %vm22_vm3, %v1899_v37  ;;  %v1572_v20 = vor.u32 %v1829_v13, %v1569_v14  ;;  %v1559_v21 = vld [vmem:[%s3076_s0 + $0x90] sm:$0xf]  ;;  %v1695_v60 = vld [vmem:[%s3076_s0 + $0x1a0] sm:$0xf] }
  0x1e   :  { %690 = vmatpush.bf16.msra.mxu0 %v1873_v26  ;;  %1889 = vmatpush.bf16.msra.mxu2 %v1873_v26  ;;  %v1852_v26 = vld [vmem:[%s3076_s0 + $0x154] sm:$0xf0]  ;;  %31 = vst.msk [vmem:[#allocation2 + $0x40] sm:$0xff] %vm22_vm3, %v1899_v37  ;;  %v152_v36 = vld [vmem:[#allocation2 + $0x8] sm:$0xff] }
  0x1f   :  { %1778 = vmatmul.msk.bf16.gmra.mxu1 %vm579_vm2, %v1500_v25  ;;  %1795 = vmatmul.msk.bf16.gmra.mxu3 %vm579_vm2, %v1636_v31  ;;  %v1655_v25 = vld [vmem:[%s3076_s0 + $0x150] sm:$0xf]  ;;  %v1545_v31 = vld [vmem:[%s3076_s0 + $0x78] sm:$0xf0]  ;;  %32 = vst.msk [vmem:[#allocation2 + $0x48] sm:$0xff] %vm22_vm3, %v1899_v37 }
  0x20   :  { %v1656_v29 = vor.u32 %v1852_v26, %v1655_v25  ;;  %v1548_v34 = vor.u32 %v1823_v30, %v1545_v31  ;;  %33 = vst.msk [vmem:[#allocation2 + $0x50] sm:$0xff] %vm22_vm3, %v1899_v37  ;;  %v1687_v25 = vld [vmem:[%s3076_s0 + $0x190] sm:$0xf]  ;;  %v1860_v26 = vld [vmem:[%s3076_s0 + $0x194] sm:$0xf0] }
  0x21   :  { %691 = vmatmul.bf16.vlgmr.msra.gmra.mxu0 %v1488_v32  ;;  %771 = vmatmul.bf16.vlgmr.msra.gmra.mxu2 %v1616_v33  ;;  %v1857_v32 = vld [vmem:[%s3076_s0 + $0x184] sm:$0xf]  ;;  %v1681_v33 = vld [vmem:[%s3076_s0 + $0x188] sm:$0xf0]  ;;  %34 = vst.msk [vmem:[#allocation2 + $0x58] sm:$0xff] %vm22_vm3, %v1899_v37 }
  0x22   :  { %v1684_v40 = vor.u32 %v1857_v32, %v1681_v33  ;;  %35 = vst.msk [vmem:[#allocation2 + $0x60] sm:$0xff] %vm22_vm3, %v1899_v37  ;;  %v1688_v32 = vor.u32 %v1860_v26, %v1687_v25  ;;  %v1862_v61 = vld [vmem:[%s3076_s0 + $0x1a4] sm:$0xf0]  ;;  %v1833_v25 = vld [vmem:[%s3076_s0 + $0xc4] sm:$0xf] }
  0x23   :  { %36 = vst.msk [vmem:[#allocation2 + $0x68] sm:$0xff] %vm22_vm3, %v1899_v37 }
  0x24   :  { %37 = vst.msk [vmem:[#allocation2 + $0x70] sm:$0xff] %vm22_vm3, %v1899_v37 }
  0x25   :  { %38 = vst.msk [vmem:[#allocation2 + $0x78] sm:$0xff] %vm22_vm3, %v1899_v37 }
  0x26   :  { %39 = vst.msk [vmem:[#allocation2 + $0x80] sm:$0xff] %vm22_vm3, %v1899_v37 }
  0x27   :  { %40 = vst.msk [vmem:[#allocation2 + $0x88] sm:$0xff] %vm22_vm3, %v1899_v37 }
  0x28   :  { %41 = vst.msk [vmem:[#allocation2 + $0x90] sm:$0xff] %vm22_vm3, %v1899_v37 }
  0x29   :  { %42 = vst.msk [vmem:[#allocation2 + $0x98] sm:$0xff] %vm22_vm3, %v1899_v37 }
  0x2a   :  { %43 = vst.msk [vmem:[#allocation2 + $0xa0] sm:$0xff] %vm22_vm3, %v1899_v37 }
  0x2b   :  { %44 = vst.msk [vmem:[#allocation2 + $0xa8] sm:$0xff] %vm22_vm3, %v1899_v37 }
  0x2c   :  { %45 = vst.msk [vmem:[#allocation2 + $0xb0] sm:$0xff] %vm22_vm3, %v1899_v37 }
  0x2d   :  { %46 = vst.msk [vmem:[#allocation2 + $0xb8] sm:$0xff] %vm22_vm3, %v1899_v37 }
  0x2e   :  { %47 = vst.msk [vmem:[#allocation2 + $0xc0] sm:$0xff] %vm22_vm3, %v1899_v37 }
  0x2f   :  { %1779 = vmatmul.msk.bf16.gmra.mxu1 %vm579_vm2, %v1508_v38  ;;  %1796 = vmatmul.msk.bf16.gmra.mxu3 %vm579_vm2, %v1644_v43  ;;  %v1663_v38 = vld [vmem:[%s3076_s0 + $0x160] sm:$0xf]  ;;  %v1825_v43 = vld [vmem:[%s3076_s0 + $0x84] sm:$0xf]  ;;  %48 = vst.msk [vmem:[#allocation2 + $0xc8] sm:$0xff] %vm22_vm3, %v1899_v37 }
  0x30   :  { %v1664_v42 = vor.u32 %v1854_v39, %v1663_v38  ;;  %49 = vst.msk [vmem:[#allocation2 + $0xd0] sm:$0xff] %vm22_vm3, %v1899_v37 }
  0x31   :  { %696 = vmatmul.bf16.gmra.mxu0 %v1496_v44  ;;  %776 = vmatmul.bf16.gmra.mxu2 %v1624_v45  ;;  %v1553_v44 = vld [vmem:[%s3076_s0 + $0x88] sm:$0xf0]  ;;  %50 = vst.msk [vmem:[#allocation2 + $0xd8] sm:$0xff] %vm22_vm3, %v1899_v37 }
  0x32   :  { %v1556_v45 = vor.u32 %v1825_v43, %v1553_v44  ;;  %51 = vst.msk [vmem:[#allocation2 + $0xe0] sm:$0xff] %vm22_vm3, %v1899_v37  ;;  %v1831_v44 = vld [vmem:[%s3076_s0 + $0xb4] sm:$0xf] }
  0x33   :  { %52 = vst.msk [vmem:[#allocation2 + $0xe8] sm:$0xff] %vm22_vm3, %v1899_v37 }
  0x34   :  { %53 = vst.msk [vmem:[#allocation2 + $0xf0] sm:$0xff] %vm22_vm3, %v1899_v37 }
  0x35   :  { %54 = vst.msk [vmem:[#allocation2 + $0xf8] sm:$0xff] %vm22_vm3, %v1899_v37 }
  0x36   :  { %55 = vst.msk [vmem:[#allocation2 + $0x100] sm:$0xff] %vm22_vm3, %v1899_v37 }
  0x37   :  { %56 = vst.msk [vmem:[#allocation2 + $0x108] sm:$0xff] %vm22_vm3, %v1899_v37 }
  0x38   :  { %57 = vst.msk [vmem:[#allocation2 + $0x110] sm:$0xff] %vm22_vm3, %v1899_v37 }
  0x39   :  { %58 = vst.msk [vmem:[#allocation2 + $0x118] sm:$0xff] %vm22_vm3, %v1899_v37 }
  0x3a   :  { %59 = vst.msk [vmem:[#allocation2 + $0x120] sm:$0xff] %vm22_vm3, %v1899_v37 }
  0x3b   :  { %60 = vst.msk [vmem:[#allocation2 + $0x128] sm:$0xff] %vm22_vm3, %v1899_v37 }
  0x3c   :  { %61 = vst.msk [vmem:[#allocation2 + $0x130] sm:$0xff] %vm22_vm3, %v1899_v37 }
  0x3d   :  { %62 = vst.msk [vmem:[#allocation2 + $0x138] sm:$0xff] %vm22_vm3, %v1899_v37 }
  0x3e   :  { %63 = vst.msk [vmem:[#allocation2 + $0x140] sm:$0xff] %vm22_vm3, %v1899_v37 }
  0x3f   :  { %1780 = vmatmul.msk.bf16.gmra.mxu1 %vm579_vm2, %v1516_v50  ;;  %1797 = vmatmul.msk.bf16.gmra.mxu3 %vm579_vm2, %v1652_v55  ;;  %v1856_v50 = vld [vmem:[%s3076_s0 + $0x174] sm:$0xf0]  ;;  %v1561_v55 = vld [vmem:[%s3076_s0 + $0x98] sm:$0xf0]  ;;  %64 = vst.msk [vmem:[#allocation2 + $0x148] sm:$0xff] %vm22_vm3, %v1899_v37  ;;  %v185_v46 = vld [vmem:[#allocation2 + $0x110] sm:$0xff] }
  0x40   :  { %v1672_v52 = vor.u32 %v1856_v50, %v1671_v49  ;;  %v1564_v59 = vor.u32 %v1827_v54, %v1561_v55  ;;  %65 = vst.msk [vmem:[#allocation2 + $0x150] sm:$0xff] %vm22_vm3, %v1899_v37  ;;  %v1705_v49 = vld [vmem:[%s3076_s0 + $0x1b8] sm:$0xf0] }
  0x41   :  { %701 = vmatmul.bf16.gmra.mxu0 %v1504_v56  ;;  %781 = vmatmul.bf16.gmra.mxu2 %v1632_v57  ;;  %v1859_v56 = vld [vmem:[%s3076_s0 + $0x194] sm:$0xf]  ;;  %v1689_v57 = vld [vmem:[%s3076_s0 + $0x198] sm:$0xf0]  ;;  %66 = vst.msk [vmem:[#allocation2 + $0x158] sm:$0xff] %vm22_vm3, %v1899_v37 }
  0x42   :  { %v1692_v58 = vor.u32 %v1859_v56, %v1689_v57  ;;  %67 = vst.msk [vmem:[#allocation2 + $0x160] sm:$0xff] %vm22_vm3, %v1899_v37  ;;  %v1567_v56 = vld [vmem:[%s3076_s0 + $0xa0] sm:$0xf]  ;;  %v1830_v57 = vld [vmem:[%s3076_s0 + $0xa4] sm:$0xf0] }
  0x43   :  { %68 = vst.msk [vmem:[#allocation2 + $0x168] sm:$0xff] %vm22_vm3, %v1899_v37 }
  0x44   :  { %69 = vst.msk [vmem:[#allocation2 + $0x170] sm:$0xff] %vm22_vm3, %v1899_v37 }
  0x45   :  { %70 = vst.msk [vmem:[#allocation2 + $0x178] sm:$0xff] %vm22_vm3, %v1899_v37 }
  0x46   :  { %71 = vst.msk [vmem:[#allocation2 + $0x180] sm:$0xff] %vm22_vm3, %v1899_v37 }
  0x47   :  { %72 = vst.msk [vmem:[#allocation2 + $0x188] sm:$0xff] %vm22_vm3, %v1899_v37 }
  0x48   :  { %73 = vst.msk [vmem:[#allocation2 + $0x190] sm:$0xff] %vm22_vm3, %v1899_v37 }
  0x49   :  { %74 = vst.msk [vmem:[#allocation2 + $0x198] sm:$0xff] %vm22_vm3, %v1899_v37 }
  0x4a   :  { %75 = vst.msk [vmem:[#allocation2 + $0x1a0] sm:$0xff] %vm22_vm3, %v1899_v37 }
  0x4b   :  { %76 = vst.msk [vmem:[#allocation2 + $0x1a8] sm:$0xff] %vm22_vm3, %v1899_v37 }
  0x4c   :  { %77 = vst.msk [vmem:[#allocation2 + $0x1b0] sm:$0xff] %vm22_vm3, %v1899_v37 }
  0x4d   :  { %78 = vst.msk [vmem:[#allocation2 + $0x1b8] sm:$0xff] %vm22_vm3, %v1899_v37 }
  0x4e   :  { %79 = vst.msk [vmem:[#allocation2 + $0x1c0] sm:$0xff] %vm22_vm3, %v1899_v37 }
  0x4f   :  { %1781 = vmatmul.msk.bf16.gmra.mxu1 %vm579_vm2, %v1524_v62  ;;  %1798 = vmatmul.msk.bf16.gmra.mxu3 %vm579_vm2, %v1660_v3  ;;  %v151_v3 = vld [vmem:[#allocation2] sm:$0xff]  ;;  %80 = vst.msk [vmem:[#allocation2 + $0x1c8] sm:$0xff] %vm22_vm3, %v1899_v37 }
  0x50   :  { %81 = vst.msk [vmem:[#allocation2 + $0x1d0] sm:$0xff] %vm22_vm3, %v1899_v37 }
  0x51   :  { %706 = vmatmul.bf16.gmra.mxu0 %v1512_v4  ;;  %786 = vmatmul.bf16.gmra.mxu2 %v1640_v5  ;;  %v1680_v5 = vor.u32 %v1858_v0, %v1679_v63  ;;  %82 = vst.msk [vmem:[#allocation2 + $0x1d8] sm:$0xff] %vm22_vm3, %v1899_v37  ;;  %v1568_v0 = vor.u32 %v1830_v57, %v1567_v56  ;;  %v188_v57 = vld [vmem:[#allocation2 + $0x128] sm:$0xff] }
  0x52   :  { %83 = vst.msk [vmem:[#allocation2 + $0x1e0] sm:$0xff] %vm22_vm3, %v1899_v37 }
  0x53   :  { %84 = vst.msk [vmem:[#allocation2 + $0x1e8] sm:$0xff] %vm22_vm3, %v1899_v37 }
  0x54   :  { %85 = vst.msk [vmem:[#allocation2 + $0x1f0] sm:$0xff] %vm22_vm3, %v1899_v37 }
  0x55   :  { %86 = vst.msk [vmem:[#allocation2 + $0x1f8] sm:$0xff] %vm22_vm3, %v1899_v37 }
  0x5f   :  { %1782 = vmatmul.msk.bf16.gmra.mxu1 %vm579_vm2, %v1532_v10  ;;  %1799 = vmatmul.msk.bf16.gmra.mxu3 %vm579_vm2, %v1668_v15  ;;  %v1861_v15 = vld [vmem:[%s3076_s0 + $0x1a4] sm:$0xf] }
  0x61   :  { %711 = vmatmul.bf16.gmra.mxu0 %v1520_v16  ;;  %791 = vmatmul.bf16.gmra.mxu2 %v1648_v17  ;;  %v1697_v16 = vld [vmem:[%s3076_s0 + $0x1a8] sm:$0xf0] }
  0x62   :  { %v1700_v17 = vor.u32 %v1861_v15, %v1697_v16 }
  0x6f   :  { %1783 = vmatmul.msk.bf16.gmra.mxu1 %vm579_vm2, %v1540_v22  ;;  %1800 = vmatmul.msk.bf16.gmra.mxu3 %vm579_vm2, %v1676_v27  ;;  %v1828_v22 = vld [vmem:[%s3076_s0 + $0x94] sm:$0xf0] }
  0x71   :  { %716 = vmatmul.bf16.gmra.mxu0 %v1528_v28  ;;  %796 = vmatmul.bf16.gmra.mxu2 %v1656_v29  ;;  %v1560_v29 = vor.u32 %v1828_v22, %v1559_v21  ;;  %v187_v22 = vld [vmem:[#allocation2 + $0x120] sm:$0xff] }
  0x7f   :  { %1784 = vmatmul.msk.bf16.gmra.mxu1 %vm579_vm2, %v1548_v34  ;;  %1801 = vmatmul.msk.bf16.gmra.mxu3 %vm579_vm2, %v1684_v40 }
  0x81   :  { %721 = vmatmul.bf16.gmra.mxu0 %v1536_v41  ;;  %801 = vmatmul.bf16.gmra.mxu2 %v1664_v42  ;;  %v153_v41 = vld [vmem:[#allocation2 + $0x10] sm:$0xff] }
  0x8c   :  { %v861_v48 = vpop.f32.mrf.mxu1 }
  0x8f   :  { %1785 = vmatmul.msk.bf16.gmra.mxu1 %vm579_vm2, %v1556_v45  ;;  %1802 = vmatmul.msk.bf16.gmra.mxu3 %vm579_vm2, %v1692_v58  ;;  %v1577_v45 = vld [vmem:[%s3076_s0 + $0xb8] sm:$0xf0] }
  0x90   :  { %v1580_v55 = vor.u32 %v1831_v44, %v1577_v45 }
  0x91   :  { %726 = vmatmul.bf16.gmra.mxu0 %v1544_v51  ;;  %806 = vmatmul.bf16.gmra.mxu2 %v1672_v52  ;;  %v154_v51 = vld [vmem:[#allocation2 + $0x18] sm:$0xff] }
  0x92   :  { %v2271_v2 = vpop.f32.mrf.mxu3 }
  0x94   :  { %v2220_v53 = vpop.f32.mrf.mxu1 }
  0x9a   :  { %v2298_v11 = vpop.f32.mrf.mxu3 }
  0x9c   :  { %v2257_v62 = vpop.f32.mrf.mxu1 }
  0x9e   :  { %v692_v4 = vpop.f32.mrf.mxu0 }
  0x9f   :  { %1786 = vmatmul.msk.bf16.gmra.mxu1 %vm579_vm2, %v1564_v59  ;;  %v862_v6 = vadd.f32 %v861_v48, %v692_v4  ;;  %1803 = vmatmul.msk.bf16.gmra.mxu3 %vm579_vm2, %v1700_v17  ;;  %v1863_v48 = vld [vmem:[%s3076_s0 + $0x1b4] sm:$0xf]  ;;  %v1696_v4 = vor.u32 %v1862_v61, %v1695_v60 }
  0xa0   :  { %v1708_v52 = vor.u32 %v1863_v48, %v1705_v49  ;;  %v1832_v48 = vld [vmem:[%s3076_s0 + $0xb4] sm:$0xf0] }
  0xa1   :  { %v1021_v7 = vadd.f32 %v862_v6, %v151_v3  ;;  %731 = vmatmul.bf16.gmra.mxu0 %v1552_v1  ;;  %811 = vmatmul.bf16.gmra.mxu2 %v1680_v5 }
  0xa2   :  { %v2352_v30 = vpop.f32.mrf.mxu3 }
  0xa3   :  { %1086 = vst.msk [vmem:[#allocation2] sm:$0xff] %vm22_vm3, %v1021_v7 }
  0xa4   :  { %v2285_v8 = vpop.f32.mrf.mxu1  ;;  %v2296_v10 = vpop.f32.mrf.mxu2 }
  0xa6   :  { %v694_v12 = vpop.f32.mrf.mxu0 }
  0xa7   :  { %v864_v35 = vadd.f32 %v2220_v53, %v694_v12 }
  0xa9   :  { %v1022_v50 = vadd.f32 %v864_v35, %v152_v36  ;;  %v156_v36 = vld [vmem:[#allocation2 + $0x28] sm:$0xff] }
  0xaa   :  { %v1153_v19 = vld [vmem:[#allocation2] sm:$0xff]  ;;  %v2377_v40 = vpop.f32.mrf.mxu3 }
  0xab   :  { %v1221_v23 = vmul.f32 %v2292_v9, %v1153_v19  ;;  %1087 = vst.msk [vmem:[#allocation2 + $0x8] sm:$0xff] %vm22_vm3, %v1022_v50 }
  0xac   :  { %v2337_v24 = vpop.f32.mrf.mxu1  ;;  %v2350_v28 = vpop.f32.mrf.mxu2 }
  0xad   :  { %v1289_v27 = vadd.f32 %v2321_v18, %v1221_v23 }
  0xae   :  { %v697_v31 = vpop.f32.mrf.mxu0 }
  0xaf   :  { %1787 = vmatmul.msk.bf16.gmra.mxu1 %vm579_vm2, %v1572_v20  ;;  %v1353_v33 = vmax.f32 %v1289_v27, 0.0  ;;  %v867_v38 = vadd.f32 %v2257_v62, %v697_v31  ;;  %1804 = vmatmul.msk.bf16.gmra.mxu3 %vm579_vm2, %v1708_v52  ;;  %v186_v62 = vld [vmem:[#allocation2 + $0x118] sm:$0xff]  ;;  %v1585_v31 = vld [vmem:[%s3076_s0 + $0xc8] sm:$0xf0] }
  0xb1   :  { %1417 = vst.msk [vmem:[%s3079_s4] sm:$0xff] %vm22_vm3, %v1353_v33  ;;  %736 = vmatmul.bf16.gmra.mxu0 %v1560_v29  ;;  %816 = vmatmul.bf16.gmra.mxu2 %v1688_v32  ;;  %v1023_v53 = vadd.f32 %v867_v38, %v153_v41  ;;  %v1865_v32 = vld [vmem:[%s3076_s0 + $0x1c4] sm:$0xf] }
  0xb2   :  { %v2422_v1 = vpop.f32.mrf.mxu3 }
  0xb3   :  { %1088 = vst.msk [vmem:[#allocation2 + $0x10] sm:$0xff] %vm22_vm3, %v1023_v53  ;;  %v1703_v53 = vld [vmem:[%s3076_s0 + $0x1b0] sm:$0xf] }
  0xb4   :  { %v2369_v34 = vpop.f32.mrf.mxu1  ;;  %v777_v39 = vpop.f32.mrf.mxu2 }
  0xb5   :  { %v947_v42 = vadd.f32 %v2271_v2, %v777_v39  ;;  %v155_v2 = vld [vmem:[#allocation2 + $0x20] sm:$0xff] }
  0xb6   :  { %v699_v43 = vpop.f32.mrf.mxu0 }
  0xb7   :  { %v869_v47 = vadd.f32 %v2285_v8, %v699_v43  ;;  %v1055_v54 = vadd.f32 %v947_v42, %v185_v46  ;;  %v1154_v8 = vld [vmem:[#allocation2 + $0x8] sm:$0xff]  ;;  %v1575_v42 = vld [vmem:[%s3076_s0 + $0xb0] sm:$0xf] }
  0xb8   :  { %v1576_v60 = vor.u32 %v1832_v48, %v1575_v42  ;;  %v1711_v42 = vld [vmem:[%s3076_s0 + $0x1c0] sm:$0xf] }
  0xb9   :  { %v1024_v58 = vadd.f32 %v869_v47, %v154_v51  ;;  %1120 = vst.msk [vmem:[#allocation2 + $0x110] sm:$0xff] %vm22_vm3, %v1055_v54  ;;  %v1588_v47 = vor.u32 %v1833_v25, %v1585_v31  ;;  %v1864_v54 = vld [vmem:[%s3076_s0 + $0x1b4] sm:$0xf0] }
  0xba   :  { %v1155_v13 = vld [vmem:[#allocation2 + $0x10] sm:$0xff]  ;;  %v2435_v17 = vpop.f32.mrf.mxu3 }
  0xbb   :  { %1089 = vst.msk [vmem:[#allocation2 + $0x18] sm:$0xff] %vm22_vm3, %v1024_v58  ;;  %v1223_v14 = vmul.f32 %v2292_v9, %v1155_v13 }
  0xbc   :  { %v2412_v59 = vpop.f32.mrf.mxu1  ;;  %v779_v63 = vpop.f32.mrf.mxu2 }
  0xbd   :  { %v949_v37 = vadd.f32 %v2298_v11, %v779_v63  ;;  %v1222_v11 = vmul.f32 %v2292_v9, %v1154_v8  ;;  %v1291_v26 = vadd.f32 %v2321_v18, %v1223_v14 }
  0xbe   :  { %v702_v3 = vpop.f32.mrf.mxu0 }
  0xbf   :  { %1788 = vmatmul.msk.bf16.gmra.mxu1 %vm579_vm2, %v1580_v55  ;;  %v872_v5 = vadd.f32 %v2337_v24, %v702_v3  ;;  %v1056_v6 = vadd.f32 %v949_v37, %v186_v62  ;;  %v1290_v19 = vadd.f32 %v2321_v18, %v1222_v11  ;;  %v1355_v39 = vmax.f32 %v1291_v26, 0.0 }
  0xc0   :  { %v1187_v15 = vld [vmem:[#allocation2 + $0x110] sm:$0xff] }
  0xc1   :  { %v1025_v7 = vadd.f32 %v872_v5, %v155_v2  ;;  %741 = vmatmul.bf16.gmra.mxu0 %v1568_v0  ;;  %1121 = vst.msk [vmem:[#allocation2 + $0x118] sm:$0xff] %vm22_vm3, %v1056_v6  ;;  %821 = vmatmul.bf16.gmra.mxu2 %v1696_v4  ;;  %v1255_v20 = vmul.f32 %v2292_v9, %v1187_v15  ;;  %v1354_v33 = vmax.f32 %v1290_v19, 0.0  ;;  %v157_v0 = vld [vmem:[#allocation2 + $0x30] sm:$0xff] }
  0xc2   :  { %v1156_v21 = vld [vmem:[#allocation2 + $0x18] sm:$0xff]  ;;  %1419 = vst.msk [vmem:[%s3079_s4 + $0x10] sm:$0xff] %vm22_vm3, %v1355_v39  ;;  %v2492_v61 = vpop.f32.mrf.mxu3  ;;  %v1704_v2 = vor.u32 %v1864_v54, %v1703_v53  ;;  %v159_v53 = vld [vmem:[#allocation2 + $0x40] sm:$0xff] }
  0xc3   :  { %1090 = vst.msk [vmem:[#allocation2 + $0x20] sm:$0xff] %vm22_vm3, %v1025_v7  ;;  %v1224_v27 = vmul.f32 %v2292_v9, %v1156_v21  ;;  %v1323_v35 = vadd.f32 %v2321_v18, %v1255_v20  ;;  %v189_v7 = vld [vmem:[#allocation2 + $0x130] sm:$0xff] }
  0xc4   :  { %v2431_v12 = vpop.f32.mrf.mxu1  ;;  %v782_v16 = vpop.f32.mrf.mxu2  ;;  %1418 = vst.msk [vmem:[%s3079_s4 + $0x8] sm:$0xff] %vm22_vm3, %v1354_v33  ;;  %v1835_v20 = vld [vmem:[%s3076_s0 + $0xd4] sm:$0xf] }
  0xc5   :  { %v952_v23 = vadd.f32 %v2352_v30, %v782_v16  ;;  %v1713_v30 = vld [vmem:[%s3076_s0 + $0x1c8] sm:$0xf0]  ;;  %v1387_v43 = vmax.f32 %v1323_v35, 0.0  ;;  %v158_v16 = vld [vmem:[#allocation2 + $0x38] sm:$0xff] }
  0xc6   :  { %v704_v24 = vpop.f32.mrf.mxu0  ;;  %v1716_v38 = vor.u32 %v1865_v32, %v1713_v30  ;;  %v1583_v32 = vld [vmem:[%s3076_s0 + $0xc0] sm:$0xf] }
  0xc7   :  { %v874_v29 = vadd.f32 %v2369_v34, %v704_v24  ;;  %v1292_v34 = vadd.f32 %v2321_v18, %v1224_v27  ;;  %v1057_v46 = vadd.f32 %v952_v23, %v187_v22  ;;  %1451 = vst.msk [vmem:[%s3079_s4 + $0x110] sm:$0xff] %vm22_vm3, %v1387_v43  ;;  %v1593_v23 = vld [vmem:[%s3076_s0 + $0xd8] sm:$0xf0]  ;;  %v1867_v24 = vld [vmem:[%s3076_s0 + $0x1d4] sm:$0xf] }
  0xc8   :  { %v1188_v41 = vld [vmem:[#allocation2 + $0x118] sm:$0xff]  ;;  %1805 = vmatmul.msk.bf16.gmra.mxu3 %vm579_vm2, %v1716_v38  ;;  %v1834_v38 = vld [vmem:[%s3076_s0 + $0xc4] sm:$0xf0] }
  0xc9   :  { %v1256_v44 = vmul.f32 %v2292_v9, %v1188_v41  ;;  %v1356_v49 = vmax.f32 %v1292_v34, 0.0  ;;  %v1026_v51 = vadd.f32 %v874_v29, %v156_v36  ;;  %1122 = vst.msk [vmem:[#allocation2 + $0x120] sm:$0xff] %vm22_vm3, %v1057_v46  ;;  %v1596_v36 = vor.u32 %v1835_v20, %v1593_v23  ;;  %v1866_v43 = vld [vmem:[%s3076_s0 + $0x1c4] sm:$0xf0]  ;;  %v190_v46 = vld [vmem:[#allocation2 + $0x138] sm:$0xff] }
  0xca   :  { %v1157_v45 = vld [vmem:[#allocation2 + $0x20] sm:$0xff]  ;;  %v2511_v11 = vpop.f32.mrf.mxu3  ;;  %v1584_v48 = vor.u32 %v1834_v38, %v1583_v32 }
  0xcb   :  { %v1225_v50 = vmul.f32 %v2292_v9, %v1157_v45  ;;  %v1324_v55 = vadd.f32 %v2321_v18, %v1256_v44  ;;  %1420 = vst.msk [vmem:[%s3079_s4 + $0x18] sm:$0xff] %vm22_vm3, %v1356_v49 }
  0xcc   :  { %v2474_v52 = vpop.f32.mrf.mxu1  ;;  %v784_v58 = vpop.f32.mrf.mxu2  ;;  %1091 = vst.msk [vmem:[#allocation2 + $0x28] sm:$0xff] %vm22_vm3, %v1026_v51 }
  0xcd   :  { %v1293_v56 = vadd.f32 %v2321_v18, %v1225_v50  ;;  %v1388_v62 = vmax.f32 %v1324_v55, 0.0  ;;  %v954_v63 = vadd.f32 %v2377_v40, %v784_v58  ;;  %v1712_v55 = vor.u32 %v1866_v43, %v1711_v42  ;;  %v161_v42 = vld [vmem:[#allocation2 + $0x50] sm:$0xff] }
  0xce   :  { %v707_v37 = vpop.f32.mrf.mxu0 }
  0xcf   :  { %1789 = vmatmul.msk.bf16.gmra.mxu1 %vm579_vm2, %v1588_v47  ;;  %v1357_v3 = vmax.f32 %v1293_v56, 0.0  ;;  %v877_v4 = vadd.f32 %v2412_v59, %v707_v37  ;;  %1452 = vst.msk [vmem:[%s3079_s4 + $0x118] sm:$0xff] %vm22_vm3, %v1388_v62  ;;  %v1058_v5 = vadd.f32 %v954_v63, %v188_v57 }
  0xd0   :  { %v1189_v59 = vld [vmem:[#allocation2 + $0x120] sm:$0xff] }
  0xd1   :  { %1421 = vst.msk [vmem:[%s3079_s4 + $0x20] sm:$0xff] %vm22_vm3, %v1357_v3  ;;  %v1027_v40 = vadd.f32 %v877_v4, %v157_v0  ;;  %746 = vmatmul.bf16.gmra.mxu0 %v1576_v60  ;;  %826 = vmatmul.bf16.gmra.mxu2 %v1704_v2  ;;  %v1257_v13 = vmul.f32 %v2292_v9, %v1189_v59  ;;  %v191_v3 = vld [vmem:[#allocation2 + $0x140] sm:$0xff] }
  0xd2   :  { %1123 = vst.msk [vmem:[#allocation2 + $0x128] sm:$0xff] %vm22_vm3, %v1058_v5  ;;  %v2560_v49 = vpop.f32.mrf.mxu3 }
  0xd3   :  { %1092 = vst.msk [vmem:[#allocation2 + $0x30] sm:$0xff] %vm22_vm3, %v1027_v40  ;;  %v1158_v14 = vld [vmem:[#allocation2 + $0x28] sm:$0xff]  ;;  %v1325_v25 = vadd.f32 %v2321_v18, %v1257_v13  ;;  %v1837_v13 = vld [vmem:[%s3076_s0 + $0xe4] sm:$0xf] }
  0xd4   :  { %v2509_v6 = vpop.f32.mrf.mxu1  ;;  %v787_v8 = vpop.f32.mrf.mxu2  ;;  %v1226_v21 = vmul.f32 %v2292_v9, %v1158_v14  ;;  %v1601_v14 = vld [vmem:[%s3076_s0 + $0xe8] sm:$0xf0] }
  0xd5   :  { %v957_v15 = vadd.f32 %v2422_v1, %v787_v8  ;;  %v1721_v1 = vld [vmem:[%s3076_s0 + $0x1d8] sm:$0xf0]  ;;  %v1389_v30 = vmax.f32 %v1325_v25, 0.0  ;;  %v1591_v25 = vld [vmem:[%s3076_s0 + $0xd0] sm:$0xf] }
  0xd6   :  { %v709_v19 = vpop.f32.mrf.mxu0  ;;  %v1724_v27 = vor.u32 %v1867_v24, %v1721_v1  ;;  %v1294_v29 = vadd.f32 %v2321_v18, %v1226_v21  ;;  %v1604_v1 = vor.u32 %v1837_v13, %v1601_v14 }
  0xd7   :  { %v879_v22 = vadd.f32 %v2431_v12, %v709_v19  ;;  %v1059_v26 = vadd.f32 %v957_v15, %v189_v7  ;;  %1453 = vst.msk [vmem:[%s3079_s4 + $0x120] sm:$0xff] %vm22_vm3, %v1389_v30  ;;  %v160_v7 = vld [vmem:[#allocation2 + $0x48] sm:$0xff]  ;;  %v1869_v19 = vld [vmem:[%s3076_s0 + $0x1e4] sm:$0xf] }
  0xd8   :  { %1806 = vmatmul.msk.bf16.gmra.mxu3 %vm579_vm2, %v1724_v27  ;;  %v1358_v39 = vmax.f32 %v1294_v29, 0.0 }
  0xd9   :  { %v1190_v31 = vld [vmem:[#allocation2 + $0x128] sm:$0xff]  ;;  %v1028_v12 = vadd.f32 %v879_v22, %v158_v16  ;;  %1124 = vst.msk [vmem:[#allocation2 + $0x130] sm:$0xff] %vm22_vm3, %v1059_v26  ;;  %v1836_v26 = vld [vmem:[%s3076_s0 + $0xd4] sm:$0xf0] }
  0xda   :  { %v1258_v33 = vmul.f32 %v2292_v9, %v1190_v31  ;;  %v1159_v35 = vld [vmem:[#allocation2 + $0x30] sm:$0xff]  ;;  %1422 = vst.msk [vmem:[%s3079_s4 + $0x28] sm:$0xff] %vm22_vm3, %v1358_v39  ;;  %v2581_v5 = vpop.f32.mrf.mxu3 }
  0xdb   :  { %v1227_v34 = vmul.f32 %v2292_v9, %v1159_v35  ;;  %1093 = vst.msk [vmem:[#allocation2 + $0x38] sm:$0xff] %vm22_vm3, %v1028_v12  ;;  %v1719_v31 = vld [vmem:[%s3076_s0 + $0x1d0] sm:$0xf]  ;;  %v1868_v12 = vld [vmem:[%s3076_s0 + $0x1d4] sm:$0xf0] }
  0xdc   :  { %v2542_v41 = vpop.f32.mrf.mxu1  ;;  %v1326_v44 = vadd.f32 %v2321_v18, %v1258_v33  ;;  %v789_v47 = vpop.f32.mrf.mxu2  ;;  %v192_v33 = vld [vmem:[#allocation2 + $0x148] sm:$0xff] }
  0xdd   :  { %v1295_v45 = vadd.f32 %v2321_v18, %v1227_v34  ;;  %v959_v51 = vadd.f32 %v2435_v17, %v789_v47 }
  0xde   :  { %v1390_v50 = vmax.f32 %v1326_v44, 0.0  ;;  %v712_v54 = vpop.f32.mrf.mxu0  ;;  %v1720_v44 = vor.u32 %v1868_v12, %v1719_v31  ;;  %v163_v31 = vld [vmem:[#allocation2 + $0x60] sm:$0xff] }
  0xdf   :  { %1790 = vmatmul.msk.bf16.gmra.mxu1 %vm579_vm2, %v1596_v36  ;;  %v1359_v56 = vmax.f32 %v1295_v45, 0.0  ;;  %v882_v57 = vadd.f32 %v2474_v52, %v712_v54  ;;  %v1060_v58 = vadd.f32 %v959_v51, %v190_v46  ;;  %v1592_v36 = vor.u32 %v1836_v26, %v1591_v25 }
  0xe0   :  { %1454 = vst.msk [vmem:[%s3079_s4 + $0x128] sm:$0xff] %vm22_vm3, %v1390_v50  ;;  %v1191_v17 = vld [vmem:[#allocation2 + $0x130] sm:$0xff] }
  0xe1   :  { %1423 = vst.msk [vmem:[%s3079_s4 + $0x30] sm:$0xff] %vm22_vm3, %v1359_v56  ;;  %v1029_v60 = vadd.f32 %v882_v57, %v159_v53  ;;  %751 = vmatmul.bf16.gmra.mxu0 %v1584_v48  ;;  %v1259_v62 = vmul.f32 %v2292_v9, %v1191_v17  ;;  %831 = vmatmul.bf16.gmra.mxu2 %v1712_v55  ;;  %v193_v56 = vld [vmem:[#allocation2 + $0x150] sm:$0xff] }
  0xe2   :  { %v1160_v63 = vld [vmem:[#allocation2 + $0x38] sm:$0xff]  ;;  %1125 = vst.msk [vmem:[#allocation2 + $0x138] sm:$0xff] %vm22_vm3, %v1060_v58  ;;  %v2626_v38 = vpop.f32.mrf.mxu3 }
  0xe3   :  { %v1228_v52 = vmul.f32 %v2292_v9, %v1160_v63  ;;  %1094 = vst.msk [vmem:[#allocation2 + $0x40] sm:$0xff] %vm22_vm3, %v1029_v60  ;;  %v1327_v37 = vadd.f32 %v2321_v18, %v1259_v62  ;;  %v162_v62 = vld [vmem:[#allocation2 + $0x58] sm:$0xff] }
  0xe4   :  { %v2577_v0 = vpop.f32.mrf.mxu1  ;;  %v792_v4 = vpop.f32.mrf.mxu2 }
  0xe5   :  { %v1296_v2 = vadd.f32 %v2321_v18, %v1228_v52  ;;  %v1391_v40 = vmax.f32 %v1327_v37, 0.0  ;;  %v962_v59 = vadd.f32 %v2492_v61, %v792_v4  ;;  %v1729_v61 = vld [vmem:[%s3076_s0 + $0x1e8] sm:$0xf0]  ;;  %v1839_v52 = vld [vmem:[%s3076_s0 + $0xf4] sm:$0xf] }
  0xe6   :  { %v714_v8 = vpop.f32.mrf.mxu0  ;;  %v1732_v21 = vor.u32 %v1869_v19, %v1729_v61  ;;  %v1609_v37 = vld [vmem:[%s3076_s0 + $0xf8] sm:$0xf0]  ;;  %v1871_v4 = vld [vmem:[%s3076_s0 + $0x1f4] sm:$0xf] }
  0xe7   :  { %v1360_v15 = vmax.f32 %v1296_v2, 0.0  ;;  %v884_v16 = vadd.f32 %v2509_v6, %v714_v8  ;;  %1455 = vst.msk [vmem:[%s3079_s4 + $0x130] sm:$0xff] %vm22_vm3, %v1391_v40  ;;  %v1061_v20 = vadd.f32 %v962_v59, %v191_v3  ;;  %v1612_v14 = vor.u32 %v1839_v52, %v1609_v37  ;;  %v1840_v52 = vld [vmem:[%s3076_s0 + $0xf4] sm:$0xf0] }
  0xe8   :  { %1807 = vmatmul.msk.bf16.gmra.mxu3 %vm579_vm2, %v1732_v21  ;;  %v1870_v21 = vld [vmem:[%s3076_s0 + $0x1e4] sm:$0xf0] }
  0xe9   :  { %1424 = vst.msk [vmem:[%s3079_s4 + $0x38] sm:$0xff] %vm22_vm3, %v1360_v15  ;;  %v1192_v6 = vld [vmem:[#allocation2 + $0x138] sm:$0xff]  ;;  %v1030_v22 = vadd.f32 %v884_v16, %v160_v7  ;;  %v1599_v15 = vld [vmem:[%s3076_s0 + $0xe0] sm:$0xf]  ;;  %v1838_v16 = vld [vmem:[%s3076_s0 + $0xe4] sm:$0xf0] }
  0xea   :  { %v1260_v23 = vmul.f32 %v2292_v9, %v1192_v6  ;;  %v1161_v24 = vld [vmem:[#allocation2 + $0x40] sm:$0xff]  ;;  %1126 = vst.msk [vmem:[#allocation2 + $0x140] sm:$0xff] %vm22_vm3, %v1061_v20  ;;  %v2647_v58 = vpop.f32.mrf.mxu3 }
  0xeb   :  { %v1229_v27 = vmul.f32 %v2292_v9, %v1161_v24  ;;  %1095 = vst.msk [vmem:[#allocation2 + $0x48] sm:$0xff] %vm22_vm3, %v1030_v22  ;;  %v1727_v20 = vld [vmem:[%s3076_s0 + $0x1e0] sm:$0xf] }
  0xec   :  { %v2616_v29 = vpop.f32.mrf.mxu1  ;;  %v1328_v32 = vadd.f32 %v2321_v18, %v1260_v23  ;;  %v794_v35 = vpop.f32.mrf.mxu2  ;;  %v194_v23 = vld [vmem:[#allocation2 + $0x158] sm:$0xff] }
  0xed   :  { %v1297_v30 = vadd.f32 %v2321_v18, %v1229_v27  ;;  %v964_v34 = vadd.f32 %v2511_v11, %v794_v35 }
  0xee   :  { %v1392_v39 = vmax.f32 %v1328_v32, 0.0  ;;  %v717_v43 = vpop.f32.mrf.mxu0  ;;  %v1728_v32 = vor.u32 %v1870_v21, %v1727_v20 }
  0xef   :  { %1791 = vmatmul.msk.bf16.gmra.mxu1 %vm579_vm2, %v1604_v1  ;;  %v1361_v45 = vmax.f32 %v1297_v30, 0.0  ;;  %v887_v46 = vadd.f32 %v2542_v41, %v717_v43  ;;  %v1062_v47 = vadd.f32 %v964_v34, %v192_v33  ;;  %v1600_v1 = vor.u32 %v1838_v16, %v1599_v15  ;;  %v165_v15 = vld [vmem:[#allocation2 + $0x70] sm:$0xff] }
  0xf0   :  { %1456 = vst.msk [vmem:[%s3079_s4 + $0x138] sm:$0xff] %vm22_vm3, %v1392_v39 }
  0xf1   :  { %1425 = vst.msk [vmem:[%s3079_s4 + $0x40] sm:$0xff] %vm22_vm3, %v1361_v45  ;;  %v1193_v11 = vld [vmem:[#allocation2 + $0x140] sm:$0xff]  ;;  %v1031_v48 = vadd.f32 %v887_v46, %v161_v42  ;;  %756 = vmatmul.bf16.gmra.mxu0 %v1592_v36  ;;  %836 = vmatmul.bf16.gmra.mxu2 %v1720_v44 }
  0xf2   :  { %v1261_v50 = vmul.f32 %v2292_v9, %v1193_v11  ;;  %v1162_v51 = vld [vmem:[#allocation2 + $0x48] sm:$0xff]  ;;  %1127 = vst.msk [vmem:[#allocation2 + $0x148] sm:$0xff] %vm22_vm3, %v1062_v47  ;;  %v2692_v25 = vpop.f32.mrf.mxu3  ;;  %v195_v45 = vld [vmem:[#allocation2 + $0x160] sm:$0xff] }
  0xf3   :  { %v1230_v41 = vmul.f32 %v2292_v9, %v1162_v51  ;;  %1096 = vst.msk [vmem:[#allocation2 + $0x50] sm:$0xff] %vm22_vm3, %v1031_v48 }
  0xf4   :  { %v2643_v53 = vpop.f32.mrf.mxu1  ;;  %v1329_v54 = vadd.f32 %v2321_v18, %v1261_v50  ;;  %v797_v57 = vpop.f32.mrf.mxu2  ;;  %v164_v50 = vld [vmem:[#allocation2 + $0x68] sm:$0xff] }
  0xf5   :  { %v1298_v55 = vadd.f32 %v2321_v18, %v1230_v41  ;;  %v967_v60 = vadd.f32 %v2560_v49, %v797_v57  ;;  %v1737_v49 = vld [vmem:[%s3076_s0 + $0x1f8] sm:$0xf0] }
  0xf6   :  { %v1393_v17 = vmax.f32 %v1329_v54, 0.0  ;;  %v719_v63 = vpop.f32.mrf.mxu0  ;;  %v1740_v59 = vor.u32 %v1871_v4, %v1737_v49  ;;  %v1872_v4 = vld [vmem:[%s3076_s0 + $0x1f4] sm:$0xf0] }
  0xf7   :  { %v1362_v2 = vmax.f32 %v1298_v55, 0.0  ;;  %v889_v3 = vadd.f32 %v2577_v0, %v719_v63  ;;  %v1063_v40 = vadd.f32 %v967_v60, %v193_v56  ;;  %v1841_v55 = vld [vmem:[%s3076_s0 + $0x104] sm:$0xf]  ;;  %v1617_v56 = vld [vmem:[%s3076_s0 + $0x108] sm:$0xf0] }
  0xf8   :  { %1457 = vst.msk [vmem:[%s3079_s4 + $0x140] sm:$0xff] %vm22_vm3, %v1393_v17  ;;  %1808 = vmatmul.msk.bf16.gmra.mxu3 %vm579_vm2, %v1740_v59  ;;  %v1607_v63 = vld [vmem:[%s3076_s0 + $0xf0] sm:$0xf]  ;;  %v196_v59 = vld [vmem:[#allocation2 + $0x168] sm:$0xff] }
  0xf9   :  { %1426 = vst.msk [vmem:[%s3079_s4 + $0x48] sm:$0xff] %vm22_vm3, %v1362_v2  ;;  %v1194_v0 = vld [vmem:[#allocation2 + $0x148] sm:$0xff]  ;;  %v1032_v7 = vadd.f32 %v889_v3, %v162_v62  ;;  %v1620_v62 = vor.u32 %v1841_v55, %v1617_v56  ;;  %v1735_v3 = vld [vmem:[%s3076_s0 + $0x1f0] sm:$0xf]  ;;  %v167_v55 = vld [vmem:[#allocation2 + $0x80] sm:$0xff] }
  0xfa   :  { %v1262_v8 = vmul.f32 %v2292_v9, %v1194_v0  ;;  %v1163_v13 = vld [vmem:[#allocation2 + $0x50] sm:$0xff]  ;;  %1128 = vst.msk [vmem:[#allocation2 + $0x150] sm:$0xff] %vm22_vm3, %v1063_v40  ;;  %v2713_v47 = vpop.f32.mrf.mxu3 }
  0xfb   :  { %v1231_v19 = vmul.f32 %v2292_v9, %v1163_v13  ;;  %1097 = vst.msk [vmem:[#allocation2 + $0x58] sm:$0xff] %vm22_vm3, %v1032_v7  ;;  %v1608_v7 = vor.u32 %v1840_v52, %v1607_v63 }
  0xfc   :  { %v2682_v61 = vpop.f32.mrf.mxu1  ;;  %v1330_v6 = vadd.f32 %v2321_v18, %v1262_v8  ;;  %v799_v24 = vpop.f32.mrf.mxu2 }
  0xfd   :  { %v1299_v22 = vadd.f32 %v2321_v18, %v1231_v19  ;;  %v969_v27 = vadd.f32 %v2581_v5, %v799_v24  ;;  %v1736_v19 = vor.u32 %v1872_v4, %v1735_v3  ;;  %v199_v3 = vld [vmem:[#allocation2 + $0x180] sm:$0xff] }
  0xfe   :  { %v1394_v26 = vmax.f32 %v1330_v6, 0.0  ;;  %v722_v12 = vpop.f32.mrf.mxu0 }
  0xff   :  { %1792 = vmatmul.msk.bf16.gmra.mxu1 %vm579_vm2, %v1612_v14  ;;  %v1363_v30 = vmax.f32 %v1299_v22, 0.0  ;;  %v892_v33 = vadd.f32 %v2616_v29, %v722_v12  ;;  %v1064_v35 = vadd.f32 %v969_v27, %v194_v23 }
 0x100   :  { %1458 = vst.msk [vmem:[%s3079_s4 + $0x148] sm:$0xff] %vm22_vm3, %v1394_v26 }
 0x101   :  { %1427 = vst.msk [vmem:[%s3079_s4 + $0x50] sm:$0xff] %vm22_vm3, %v1363_v30  ;;  %v1195_v5 = vld [vmem:[#allocation2 + $0x150] sm:$0xff]  ;;  %v1033_v36 = vadd.f32 %v892_v33, %v163_v31  ;;  %761 = vmatmul.bf16.gmra.mxu0 %v1600_v1  ;;  %841 = vmatmul.bf16.gmra.mxu2 %v1728_v32 }
 0x102   :  { %v1263_v39 = vmul.f32 %v2292_v9, %v1195_v5  ;;  %v1164_v34 = vld [vmem:[#allocation2 + $0x58] sm:$0xff]  ;;  %1129 = vst.msk [vmem:[#allocation2 + $0x158] sm:$0xff] %vm22_vm3, %v1064_v35  ;;  %v2749_v8 = vpop.f32.mrf.mxu3  ;;  %v197_v31 = vld [vmem:[#allocation2 + $0x170] sm:$0xff] }
 0x103   :  { %v1232_v29 = vmul.f32 %v2292_v9, %v1164_v34  ;;  %1098 = vst.msk [vmem:[#allocation2 + $0x60] sm:$0xff] %vm22_vm3, %v1033_v36  ;;  %v166_v35 = vld [vmem:[#allocation2 + $0x78] sm:$0xff] }
 0x104   :  { %v2709_v42 = vpop.f32.mrf.mxu1  ;;  %v1331_v43 = vadd.f32 %v2321_v18, %v1263_v39  ;;  %v802_v46 = vpop.f32.mrf.mxu2 }
 0x105   :  { %v1300_v44 = vadd.f32 %v2321_v18, %v1232_v29  ;;  %v972_v48 = vadd.f32 %v2626_v38, %v802_v46 }
 0x106   :  { %v1395_v11 = vmax.f32 %v1331_v43, 0.0  ;;  %v724_v51 = vpop.f32.mrf.mxu0 }
 0x107   :  { %v1364_v41 = vmax.f32 %v1300_v44, 0.0  ;;  %v894_v54 = vadd.f32 %v2643_v53, %v724_v51  ;;  %v1065_v57 = vadd.f32 %v972_v48, %v195_v45  ;;  %v198_v48 = vld [vmem:[#allocation2 + $0x178] sm:$0xff] }
 0x108   :  { %1459 = vst.msk [vmem:[%s3079_s4 + $0x150] sm:$0xff] %vm22_vm3, %v1395_v11 }
 0x109   :  { %1428 = vst.msk [vmem:[%s3079_s4 + $0x58] sm:$0xff] %vm22_vm3, %v1364_v41  ;;  %v1196_v38 = vld [vmem:[#allocation2 + $0x158] sm:$0xff]  ;;  %v1034_v53 = vadd.f32 %v894_v54, %v164_v50 }
 0x10a   :  { %v1264_v17 = vmul.f32 %v2292_v9, %v1196_v38  ;;  %v1165_v60 = vld [vmem:[#allocation2 + $0x60] sm:$0xff]  ;;  %1130 = vst.msk [vmem:[#allocation2 + $0x160] sm:$0xff] %vm22_vm3, %v1065_v57  ;;  %v2768_v32 = vpop.f32.mrf.mxu3 }
 0x10b   :  { %v1233_v37 = vmul.f32 %v2292_v9, %v1165_v60  ;;  %1099 = vst.msk [vmem:[#allocation2 + $0x68] sm:$0xff] %vm22_vm3, %v1034_v53 }
 0x10c   :  { %v901_v2 = vpop.f32.mrf.mxu1  ;;  %v1332_v49 = vadd.f32 %v2321_v18, %v1264_v17  ;;  %v804_v0 = vpop.f32.mrf.mxu2 }
 0x10d   :  { %v1301_v40 = vadd.f32 %v2321_v18, %v1233_v37  ;;  %v974_v14 = vadd.f32 %v2647_v58, %v804_v0  ;;  %v168_v0 = vld [vmem:[#allocation2 + $0x88] sm:$0xff] }
 0x10e   :  { %v1396_v13 = vmax.f32 %v1332_v49, 0.0  ;;  %v727_v16 = vpop.f32.mrf.mxu0 }
 0x10f   :  { %1793 = vmatmul.msk.bf16.gmra.mxu1 %vm579_vm2, %v1620_v62  ;;  %v1365_v20 = vmax.f32 %v1301_v40, 0.0  ;;  %v897_v21 = vadd.f32 %v2682_v61, %v727_v16  ;;  %v1066_v6 = vadd.f32 %v974_v14, %v196_v59 }
 0x110   :  { %1460 = vst.msk [vmem:[%s3079_s4 + $0x158] sm:$0xff] %vm22_vm3, %v1396_v13 }
 0x111   :  { %1429 = vst.msk [vmem:[%s3079_s4 + $0x60] sm:$0xff] %vm22_vm3, %v1365_v20  ;;  %v1197_v58 = vld [vmem:[#allocation2 + $0x160] sm:$0xff]  ;;  %v1035_v22 = vadd.f32 %v897_v21, %v165_v15  ;;  %766 = vmatmul.bf16.gmra.mxu0 %v1608_v7  ;;  %846 = vmatmul.bf16.gmra.mxu2 %v1736_v19 }
 0x112   :  { %v1265_v23 = vmul.f32 %v2292_v9, %v1197_v58  ;;  %v1166_v24 = vld [vmem:[#allocation2 + $0x68] sm:$0xff]  ;;  %1131 = vst.msk [vmem:[#allocation2 + $0x168] sm:$0xff] %vm22_vm3, %v1066_v6  ;;  %v2786_v51 = vpop.f32.mrf.mxu3 }
 0x113   :  { %v1234_v61 = vmul.f32 %v2292_v9, %v1166_v24  ;;  %1100 = vst.msk [vmem:[#allocation2 + $0x70] sm:$0xff] %vm22_vm3, %v1035_v22 }
 0x114   :  { %v903_v1 = vpop.f32.mrf.mxu1  ;;  %v1333_v26 = vadd.f32 %v2321_v18, %v1265_v23  ;;  %v807_v12 = vpop.f32.mrf.mxu2  ;;  %v200_v23 = vld [vmem:[#allocation2 + $0x188] sm:$0xff] }
 0x115   :  { %v1302_v27 = vadd.f32 %v2321_v18, %v1234_v61  ;;  %v977_v33 = vadd.f32 %v2692_v25, %v807_v12 }
 0x116   :  { %v1397_v30 = vmax.f32 %v1333_v26, 0.0  ;;  %v729_v5 = vpop.f32.mrf.mxu0  ;;  %v169_v26 = vld [vmem:[#allocation2 + $0x90] sm:$0xff] }
 0x117   :  { %v1366_v36 = vmax.f32 %v1302_v27, 0.0  ;;  %v899_v39 = vadd.f32 %v2709_v42, %v729_v5  ;;  %v1067_v34 = vadd.f32 %v977_v33, %v197_v31 }
 0x118   :  { %1461 = vst.msk [vmem:[%s3079_s4 + $0x160] sm:$0xff] %vm22_vm3, %v1397_v30 }
 0x119   :  { %1430 = vst.msk [vmem:[%s3079_s4 + $0x68] sm:$0xff] %vm22_vm3, %v1366_v36  ;;  %v1198_v29 = vld [vmem:[#allocation2 + $0x168] sm:$0xff]  ;;  %v1036_v43 = vadd.f32 %v899_v39, %v166_v35 }
 0x11a   :  { %v1266_v25 = vmul.f32 %v2292_v9, %v1198_v29  ;;  %v1167_v44 = vld [vmem:[#allocation2 + $0x70] sm:$0xff]  ;;  %1132 = vst.msk [vmem:[#allocation2 + $0x170] sm:$0xff] %vm22_vm3, %v1067_v34  ;;  %v2803_v49 = vpop.f32.mrf.mxu3 }
 0x11b   :  { %v1235_v42 = vmul.f32 %v2292_v9, %v1167_v44  ;;  %1101 = vst.msk [vmem:[#allocation2 + $0x78] sm:$0xff] %vm22_vm3, %v1036_v43 }
 0x11c   :  { %v906_v45 = vpop.f32.mrf.mxu1  ;;  %v1334_v46 = vadd.f32 %v2321_v18, %v1266_v25  ;;  %v809_v50 = vpop.f32.mrf.mxu2  ;;  %v201_v25 = vld [vmem:[#allocation2 + $0x190] sm:$0xff] }
 0x11d   :  { %v1303_v11 = vadd.f32 %v2321_v18, %v1235_v42  ;;  %v979_v54 = vadd.f32 %v2713_v47, %v809_v50 }
 0x11e   :  { %v1398_v41 = vmax.f32 %v1334_v46, 0.0  ;;  %v732_v56 = vpop.f32.mrf.mxu0  ;;  %v170_v46 = vld [vmem:[#allocation2 + $0x98] sm:$0xff] }
 0x11f   :  { %v1367_v57 = vmax.f32 %v1303_v11, 0.0  ;;  %v902_v38 = vadd.f32 %v901_v2, %v732_v56  ;;  %v1068_v53 = vadd.f32 %v979_v54, %v198_v48 }
 0x120   :  { %1462 = vst.msk [vmem:[%s3079_s4 + $0x168] sm:$0xff] %vm22_vm3, %v1398_v41 }
 0x121   :  { %1431 = vst.msk [vmem:[%s3079_s4 + $0x70] sm:$0xff] %vm22_vm3, %v1367_v57  ;;  %v1199_v17 = vld [vmem:[#allocation2 + $0x170] sm:$0xff]  ;;  %v1037_v60 = vadd.f32 %v902_v38, %v167_v55 }
 0x122   :  { %v1267_v62 = vmul.f32 %v2292_v9, %v1199_v17  ;;  %v1168_v47 = vld [vmem:[#allocation2 + $0x78] sm:$0xff]  ;;  %1133 = vst.msk [vmem:[#allocation2 + $0x178] sm:$0xff] %vm22_vm3, %v1068_v53  ;;  %v2821_v30 = vpop.f32.mrf.mxu3 }
 0x123   :  { %v1236_v63 = vmul.f32 %v2292_v9, %v1168_v47  ;;  %1102 = vst.msk [vmem:[#allocation2 + $0x80] sm:$0xff] %vm22_vm3, %v1037_v60 }
 0x124   :  { %v908_v52 = vpop.f32.mrf.mxu1  ;;  %v1335_v37 = vadd.f32 %v2321_v18, %v1267_v62  ;;  %v812_v4 = vpop.f32.mrf.mxu2  ;;  %v202_v62 = vld [vmem:[#allocation2 + $0x198] sm:$0xff] }
 0x125   :  { %v1304_v2 = vadd.f32 %v2321_v18, %v1236_v63  ;;  %v982_v59 = vadd.f32 %v2749_v8, %v812_v4 }
 0x126   :  { %v1399_v40 = vmax.f32 %v1335_v37, 0.0  ;;  %v734_v7 = vpop.f32.mrf.mxu0  ;;  %v171_v37 = vld [vmem:[#allocation2 + $0xa0] sm:$0xff] }
 0x127   :  { %v1368_v13 = vmax.f32 %v1304_v2, 0.0  ;;  %v904_v14 = vadd.f32 %v903_v1, %v734_v7  ;;  %v1069_v15 = vadd.f32 %v982_v59, %v199_v3 }
 0x128   :  { %1463 = vst.msk [vmem:[%s3079_s4 + $0x170] sm:$0xff] %vm22_vm3, %v1399_v40 }
 0x129   :  { %1432 = vst.msk [vmem:[%s3079_s4 + $0x78] sm:$0xff] %vm22_vm3, %v1368_v13  ;;  %v1200_v16 = vld [vmem:[#allocation2 + $0x178] sm:$0xff]  ;;  %v1038_v19 = vadd.f32 %v904_v14, %v168_v0 }
 0x12a   :  { %v1268_v20 = vmul.f32 %v2292_v9, %v1200_v16  ;;  %v1169_v8 = vld [vmem:[#allocation2 + $0x80] sm:$0xff]  ;;  %1134 = vst.msk [vmem:[#allocation2 + $0x180] sm:$0xff] %vm22_vm3, %v1069_v15  ;;  %v993_v55 = vpop.f32.mrf.mxu3 }
 0x12b   :  { %v1237_v21 = vmul.f32 %v2292_v9, %v1169_v8  ;;  %1103 = vst.msk [vmem:[#allocation2 + $0x88] sm:$0xff] %vm22_vm3, %v1038_v19  ;;  %v2873_v15 = vld [vmem:[%s3078_s3] ss:$0 sm:$0xff] }
 0x12c   :  { %v911_v6 = vpop.f32.mrf.mxu1  ;;  %v1336_v58 = vadd.f32 %v2321_v18, %v1268_v20  ;;  %v814_v24 = vpop.f32.mrf.mxu2  ;;  %v203_v20 = vld [vmem:[#allocation2 + $0x1a0] sm:$0xff] }
 0x12d   :  { %v1305_v22 = vadd.f32 %v2321_v18, %v1237_v21  ;;  %v984_v1 = vadd.f32 %v2768_v32, %v814_v24 }
 0x12e   :  { %v1400_v61 = vmax.f32 %v1336_v58, 0.0  ;;  %v737_v27 = vpop.f32.mrf.mxu0  ;;  %v172_v58 = vld [vmem:[#allocation2 + $0xa8] sm:$0xff] }
 0x12f   :  { %v1369_v31 = vmax.f32 %v1305_v22, 0.0  ;;  %v907_v12 = vadd.f32 %v906_v45, %v737_v27  ;;  %v1070_v33 = vadd.f32 %v984_v1, %v200_v23 }
 0x130   :  { %1464 = vst.msk [vmem:[%s3079_s4 + $0x178] sm:$0xff] %vm22_vm3, %v1400_v61 }
 0x131   :  { %1433 = vst.msk [vmem:[%s3079_s4 + $0x80] sm:$0xff] %vm22_vm3, %v1369_v31  ;;  %v1201_v35 = vld [vmem:[#allocation2 + $0x180] sm:$0xff]  ;;  %v1039_v5 = vadd.f32 %v907_v12, %v169_v26 }
 0x132   :  { %v1269_v32 = vmul.f32 %v2292_v9, %v1201_v35  ;;  %v1170_v36 = vld [vmem:[#allocation2 + $0x88] sm:$0xff]  ;;  %1135 = vst.msk [vmem:[#allocation2 + $0x188] sm:$0xff] %vm22_vm3, %v1070_v33  ;;  %v996_v14 = vpop.f32.mrf.mxu3 }
 0x133   :  { %v1238_v39 = vmul.f32 %v2292_v9, %v1170_v36  ;;  %1104 = vst.msk [vmem:[#allocation2 + $0x90] sm:$0xff] %vm22_vm3, %v1039_v5  ;;  %v204_v5 = vld [vmem:[#allocation2 + $0x1a8] sm:$0xff] }
 0x134   :  { %v913_v34 = vpop.f32.mrf.mxu1  ;;  %v1337_v29 = vadd.f32 %v2321_v18, %v1269_v32  ;;  %v817_v44 = vpop.f32.mrf.mxu2 }
 0x135   :  { %v1306_v43 = vadd.f32 %v2321_v18, %v1238_v39  ;;  %v987_v45 = vadd.f32 %v2786_v51, %v817_v44  ;;  %v2849_v51 = vld [vmem:[%s3077_s2] ss:$0 sm:$0xff] }
 0x136   :  { %v1401_v42 = vmax.f32 %v1337_v29, 0.0  ;;  %v739_v11 = vpop.f32.mrf.mxu0  ;;  %v173_v29 = vld [vmem:[#allocation2 + $0xb0] sm:$0xff] }
 0x137   :  { %v1370_v48 = vmax.f32 %v1306_v43, 0.0  ;;  %v909_v50 = vadd.f32 %v908_v52, %v739_v11  ;;  %v1071_v9 = vadd.f32 %v987_v45, %v201_v25 }
 0x138   :  { %1465 = vst.msk [vmem:[%s3079_s4 + $0x180] sm:$0xff] %vm22_vm3, %v1401_v42 }
 0x139   :  { %1434 = vst.msk [vmem:[%s3079_s4 + $0x88] sm:$0xff] %vm22_vm3, %v1370_v48  ;;  %v1202_v41 = vld [vmem:[#allocation2 + $0x188] sm:$0xff]  ;;  %v1040_v54 = vadd.f32 %v909_v50, %v170_v46 }
 0x13a   :  { %v1270_v56 = vmul.f32 %v2849_v51, %v1202_v41  ;;  %v1171_v57 = vld [vmem:[#allocation2 + $0x90] sm:$0xff]  ;;  %1136 = vst.msk [vmem:[#allocation2 + $0x190] sm:$0xff] %vm22_vm3, %v1071_v9  ;;  %v998_v36 = vpop.f32.mrf.mxu3 }
 0x13b   :  { %v1239_v38 = vmul.f32 %v2849_v51, %v1171_v57  ;;  %1105 = vst.msk [vmem:[#allocation2 + $0x98] sm:$0xff] %vm22_vm3, %v1040_v54 }
 0x13c   :  { %v916_v53 = vpop.f32.mrf.mxu1  ;;  %v1338_v17 = vadd.f32 %v2321_v18, %v1270_v56  ;;  %v819_v47 = vpop.f32.mrf.mxu2 }
 0x13d   :  { %v1307_v60 = vadd.f32 %v2321_v18, %v1239_v38  ;;  %v989_v52 = vadd.f32 %v2803_v49, %v819_v47 }
 0x13e   :  { %v1402_v63 = vmax.f32 %v1338_v17, 0.0  ;;  %v742_v2 = vpop.f32.mrf.mxu0 }
 0x13f   :  { %v1371_v3 = vmax.f32 %v1307_v60, 0.0  ;;  %v912_v4 = vadd.f32 %v911_v6, %v742_v2  ;;  %v1072_v40 = vadd.f32 %v989_v52, %v202_v62 }
 0x140   :  { %1466 = vst.msk [vmem:[%s3079_s4 + $0x188] sm:$0xff] %vm22_vm3, %v1402_v63 }
 0x141   :  { %1435 = vst.msk [vmem:[%s3079_s4 + $0x90] sm:$0xff] %vm22_vm3, %v1371_v3  ;;  %v1203_v18 = vld [vmem:[#allocation2 + $0x190] sm:$0xff]  ;;  %v1041_v59 = vadd.f32 %v912_v4, %v171_v37 }
 0x142   :  { %v1271_v0 = vmul.f32 %v2849_v51, %v1203_v18  ;;  %v1172_v49 = vld [vmem:[#allocation2 + $0x98] sm:$0xff]  ;;  %1137 = vst.msk [vmem:[#allocation2 + $0x198] sm:$0xff] %vm22_vm3, %v1072_v40 }
 0x143   :  { %v1240_v7 = vmul.f32 %v2849_v51, %v1172_v49  ;;  %1106 = vst.msk [vmem:[#allocation2 + $0xa0] sm:$0xff] %vm22_vm3, %v1041_v59 }
 0x144   :  { %v918_v13 = vpop.f32.mrf.mxu1  ;;  %v1339_v16 = vadd.f32 %v2873_v15, %v1271_v0  ;;  %v822_v8 = vpop.f32.mrf.mxu2  ;;  %v206_v0 = vld [vmem:[#allocation2 + $0x1b8] sm:$0xff] }
 0x145   :  { %v1308_v19 = vadd.f32 %v2873_v15, %v1240_v7  ;;  %v992_v6 = vadd.f32 %v2821_v30, %v822_v8 }
 0x146   :  { %v1403_v21 = vmax.f32 %v1339_v16, 0.0  ;;  %v744_v22 = vpop.f32.mrf.mxu0 }
 0x147   :  { %v1372_v23 = vmax.f32 %v1308_v19, 0.0  ;;  %v914_v24 = vadd.f32 %v913_v34, %v744_v22  ;;  %v1073_v61 = vadd.f32 %v992_v6, %v203_v20 }
 0x148   :  { %1467 = vst.msk [vmem:[%s3079_s4 + $0x190] sm:$0xff] %vm22_vm3, %v1403_v21 }
 0x149   :  { %1436 = vst.msk [vmem:[%s3079_s4 + $0x98] sm:$0xff] %vm22_vm3, %v1372_v23  ;;  %v1204_v1 = vld [vmem:[#allocation2 + $0x198] sm:$0xff]  ;;  %v1042_v26 = vadd.f32 %v914_v24, %v172_v58 }
 0x14a   :  { %v1272_v27 = vmul.f32 %v2849_v51, %v1204_v1  ;;  %v1173_v31 = vld [vmem:[#allocation2 + $0xa0] sm:$0xff]  ;;  %1138 = vst.msk [vmem:[#allocation2 + $0x1a0] sm:$0xff] %vm22_vm3, %v1073_v61 }
 0x14b   :  { %v1241_v12 = vmul.f32 %v2849_v51, %v1173_v31  ;;  %1107 = vst.msk [vmem:[#allocation2 + $0xa8] sm:$0xff] %vm22_vm3, %v1042_v26  ;;  %v1001_v47 = vpop.f32.mrf.mxu3 }
 0x14c   :  { %v921_v30 = vpop.f32.mrf.mxu1  ;;  %v1340_v33 = vadd.f32 %v2873_v15, %v1272_v27  ;;  %v824_v32 = vpop.f32.mrf.mxu2  ;;  %v207_v27 = vld [vmem:[#allocation2 + $0x1c0] sm:$0xff] }
 0x14d   :  { %v1309_v35 = vadd.f32 %v2873_v15, %v1241_v12  ;;  %v994_v34 = vadd.f32 %v993_v55, %v824_v32  ;;  %v205_v55 = vld [vmem:[#allocation2 + $0x1b0] sm:$0xff] }
 0x14e   :  { %v1404_v39 = vmax.f32 %v1340_v33, 0.0  ;;  %v747_v43 = vpop.f32.mrf.mxu0  ;;  %v176_v33 = vld [vmem:[#allocation2 + $0xc8] sm:$0xff] }
 0x14f   :  { %v1373_v25 = vmax.f32 %v1309_v35, 0.0  ;;  %v917_v44 = vadd.f32 %v916_v53, %v747_v43  ;;  %v1074_v42 = vadd.f32 %v994_v34, %v204_v5  ;;  %v174_v53 = vld [vmem:[#allocation2 + $0xb8] sm:$0xff] }
 0x150   :  { %1468 = vst.msk [vmem:[%s3079_s4 + $0x198] sm:$0xff] %vm22_vm3, %v1404_v39 }
 0x151   :  { %1437 = vst.msk [vmem:[%s3079_s4 + $0xa0] sm:$0xff] %vm22_vm3, %v1373_v25  ;;  %v1205_v45 = vld [vmem:[#allocation2 + $0x1a0] sm:$0xff]  ;;  %v1043_v46 = vadd.f32 %v917_v44, %v173_v29 }
 0x152   :  { %v1273_v11 = vmul.f32 %v2849_v51, %v1205_v45  ;;  %v1174_v48 = vld [vmem:[#allocation2 + $0xa8] sm:$0xff]  ;;  %1139 = vst.msk [vmem:[#allocation2 + $0x1a8] sm:$0xff] %vm22_vm3, %v1074_v42 }
 0x153   :  { %v1242_v50 = vmul.f32 %v2849_v51, %v1174_v48  ;;  %1108 = vst.msk [vmem:[#allocation2 + $0xb0] sm:$0xff] %vm22_vm3, %v1043_v46  ;;  %v1003_v58 = vpop.f32.mrf.mxu3 }
 0x154   :  { %v923_v9 = vpop.f32.mrf.mxu1  ;;  %v1341_v41 = vadd.f32 %v2873_v15, %v1273_v11  ;;  %v827_v56 = vpop.f32.mrf.mxu2  ;;  %v208_v11 = vld [vmem:[#allocation2 + $0x1c8] sm:$0xff] }
 0x155   :  { %v1310_v54 = vadd.f32 %v2873_v15, %v1242_v50  ;;  %v997_v38 = vadd.f32 %v996_v14, %v827_v56  ;;  %v175_v14 = vld [vmem:[#allocation2 + $0xc0] sm:$0xff] }
 0x156   :  { %v1405_v57 = vmax.f32 %v1341_v41, 0.0  ;;  %v749_v17 = vpop.f32.mrf.mxu0  ;;  %v177_v41 = vld [vmem:[#allocation2 + $0xd0] sm:$0xff] }
 0x157   :  { %v1374_v60 = vmax.f32 %v1310_v54, 0.0  ;;  %v919_v62 = vadd.f32 %v918_v13, %v749_v17  ;;  %v1075_v63 = vadd.f32 %v997_v38, %v205_v55 }
 0x158   :  { %1469 = vst.msk [vmem:[%s3079_s4 + $0x1a0] sm:$0xff] %vm22_vm3, %v1405_v57 }
 0x159   :  { %1438 = vst.msk [vmem:[%s3079_s4 + $0xa8] sm:$0xff] %vm22_vm3, %v1374_v60  ;;  %v1206_v52 = vld [vmem:[#allocation2 + $0x1a8] sm:$0xff]  ;;  %v1044_v37 = vadd.f32 %v919_v62, %v174_v53 }
 0x15a   :  { %v1274_v2 = vmul.f32 %v2849_v51, %v1206_v52  ;;  %v1175_v3 = vld [vmem:[#allocation2 + $0xb0] sm:$0xff]  ;;  %1140 = vst.msk [vmem:[#allocation2 + $0x1b0] sm:$0xff] %vm22_vm3, %v1075_v63 }
 0x15b   :  { %v1243_v4 = vmul.f32 %v2849_v51, %v1175_v3  ;;  %1109 = vst.msk [vmem:[#allocation2 + $0xb8] sm:$0xff] %vm22_vm3, %v1044_v37  ;;  %v1006_v42 = vpop.f32.mrf.mxu3  ;;  %v209_v37 = vld [vmem:[#allocation2 + $0x1d0] sm:$0xff] }
 0x15c   :  { %v926_v40 = vpop.f32.mrf.mxu1  ;;  %v1342_v18 = vadd.f32 %v2873_v15, %v1274_v2  ;;  %v829_v49 = vpop.f32.mrf.mxu2 }
 0x15d   :  { %v1311_v59 = vadd.f32 %v2873_v15, %v1243_v4  ;;  %v999_v13 = vadd.f32 %v998_v36, %v829_v49 }
 0x15e   :  { %v1406_v7 = vmax.f32 %v1342_v18, 0.0  ;;  %v752_v16 = vpop.f32.mrf.mxu0  ;;  %v178_v18 = vld [vmem:[#allocation2 + $0xd8] sm:$0xff] }
 0x15f   :  { %v1375_v19 = vmax.f32 %v1311_v59, 0.0  ;;  %v922_v20 = vadd.f32 %v921_v30, %v752_v16  ;;  %v1076_v8 = vadd.f32 %v999_v13, %v206_v0 }
 0x160   :  { %1470 = vst.msk [vmem:[%s3079_s4 + $0x1a8] sm:$0xff] %vm22_vm3, %v1406_v7 }
 0x161   :  { %1439 = vst.msk [vmem:[%s3079_s4 + $0xb0] sm:$0xff] %vm22_vm3, %v1375_v19  ;;  %v1207_v21 = vld [vmem:[#allocation2 + $0x1b0] sm:$0xff]  ;;  %v1045_v6 = vadd.f32 %v922_v20, %v175_v14 }
 0x162   :  { %v1275_v22 = vmul.f32 %v2849_v51, %v1207_v21  ;;  %v1176_v23 = vld [vmem:[#allocation2 + $0xb8] sm:$0xff]  ;;  %1141 = vst.msk [vmem:[#allocation2 + $0x1b8] sm:$0xff] %vm22_vm3, %v1076_v8 }
 0x163   :  { %v1244_v24 = vmul.f32 %v2849_v51, %v1176_v23  ;;  %1110 = vst.msk [vmem:[#allocation2 + $0xc0] sm:$0xff] %vm22_vm3, %v1045_v6  ;;  %v1008_v3 = vpop.f32.mrf.mxu3 }
 0x164   :  { %v928_v61 = vpop.f32.mrf.mxu1  ;;  %v1343_v1 = vadd.f32 %v2873_v15, %v1275_v22  ;;  %v832_v31 = vpop.f32.mrf.mxu2 }
 0x165   :  { %v1312_v26 = vadd.f32 %v2873_v15, %v1244_v24  ;;  %v1002_v30 = vadd.f32 %v1001_v47, %v832_v31 }
 0x166   :  { %v1407_v12 = vmax.f32 %v1343_v1, 0.0  ;;  %v754_v35 = vpop.f32.mrf.mxu0 }
 0x167   :  { %v1376_v5 = vmax.f32 %v1312_v26, 0.0  ;;  %v924_v32 = vadd.f32 %v923_v9, %v754_v35  ;;  %v1077_v36 = vadd.f32 %v1002_v30, %v207_v27 }
 0x168   :  { %1471 = vst.msk [vmem:[%s3079_s4 + $0x1b0] sm:$0xff] %vm22_vm3, %v1407_v12 }
 0x169   :  { %1440 = vst.msk [vmem:[%s3079_s4 + $0xb8] sm:$0xff] %vm22_vm3, %v1376_v5  ;;  %v1208_v39 = vld [vmem:[#allocation2 + $0x1b8] sm:$0xff]  ;;  %v1046_v34 = vadd.f32 %v924_v32, %v176_v33 }
 0x16a   :  { %v1276_v29 = vmul.f32 %v2849_v51, %v1208_v39  ;;  %v1177_v43 = vld [vmem:[#allocation2 + $0xc0] sm:$0xff]  ;;  %1142 = vst.msk [vmem:[#allocation2 + $0x1c0] sm:$0xff] %vm22_vm3, %v1077_v36 }
 0x16b   :  { %v1245_v25 = vmul.f32 %v2849_v51, %v1177_v43  ;;  %1111 = vst.msk [vmem:[#allocation2 + $0xc8] sm:$0xff] %vm22_vm3, %v1046_v34  ;;  %v1011_v27 = vpop.f32.mrf.mxu3 }
 0x16c   :  { %v931_v44 = vpop.f32.mrf.mxu1  ;;  %v1344_v45 = vadd.f32 %v2873_v15, %v1276_v29  ;;  %v834_v48 = vpop.f32.mrf.mxu2  ;;  %v211_v29 = vld [vmem:[#allocation2 + $0x1e0] sm:$0xff] }
 0x16d   :  { %v1313_v46 = vadd.f32 %v2873_v15, %v1245_v25  ;;  %v1004_v9 = vadd.f32 %v1003_v58, %v834_v48  ;;  %v210_v58 = vld [vmem:[#allocation2 + $0x1d8] sm:$0xff] }
 0x16e   :  { %v1408_v50 = vmax.f32 %v1344_v45, 0.0  ;;  %v757_v54 = vpop.f32.mrf.mxu0 }
 0x16f   :  { %v1377_v55 = vmax.f32 %v1313_v46, 0.0  ;;  %v927_v56 = vadd.f32 %v926_v40, %v757_v54  ;;  %v1078_v57 = vadd.f32 %v1004_v9, %v208_v11 }
 0x170   :  { %1472 = vst.msk [vmem:[%s3079_s4 + $0x1b8] sm:$0xff] %vm22_vm3, %v1408_v50 }
 0x171   :  { %1441 = vst.msk [vmem:[%s3079_s4 + $0xc0] sm:$0xff] %vm22_vm3, %v1377_v55  ;;  %v1209_v38 = vld [vmem:[#allocation2 + $0x1c0] sm:$0xff]  ;;  %v1047_v53 = vadd.f32 %v927_v56, %v177_v41 }
 0x172   :  { %v1277_v17 = vmul.f32 %v2849_v51, %v1209_v38  ;;  %v1178_v60 = vld [vmem:[#allocation2 + $0xc8] sm:$0xff]  ;;  %1143 = vst.msk [vmem:[#allocation2 + $0x1c8] sm:$0xff] %vm22_vm3, %v1078_v57  ;;  %v183_v57 = vld [vmem:[#allocation2 + $0x100] sm:$0xff] }
 0x173   :  { %v1246_v62 = vmul.f32 %v2849_v51, %v1178_v60  ;;  %1112 = vst.msk [vmem:[#allocation2 + $0xd0] sm:$0xff] %vm22_vm3, %v1047_v53  ;;  %v1013_v9 = vpop.f32.mrf.mxu3 }
 0x174   :  { %v933_v47 = vpop.f32.mrf.mxu1  ;;  %v1345_v63 = vadd.f32 %v2873_v15, %v1277_v17  ;;  %v837_v2 = vpop.f32.mrf.mxu2 }
 0x175   :  { %v1314_v52 = vadd.f32 %v2873_v15, %v1246_v62  ;;  %v1007_v40 = vadd.f32 %v1006_v42, %v837_v2  ;;  %v180_v42 = vld [vmem:[#allocation2 + $0xe8] sm:$0xff]  ;;  %v181_v2 = vld [vmem:[#allocation2 + $0xf0] sm:$0xff] }
 0x176   :  { %v1409_v4 = vmax.f32 %v1345_v63, 0.0  ;;  %v759_v59 = vpop.f32.mrf.mxu0  ;;  %v212_v62 = vld [vmem:[#allocation2 + $0x1e8] sm:$0xff] }
 0x177   :  { %v1378_v0 = vmax.f32 %v1314_v52, 0.0  ;;  %v929_v49 = vadd.f32 %v928_v61, %v759_v59  ;;  %v1079_v7 = vadd.f32 %v1007_v40, %v209_v37  ;;  %v179_v61 = vld [vmem:[#allocation2 + $0xe0] sm:$0xff] }
 0x178   :  { %1473 = vst.msk [vmem:[%s3079_s4 + $0x1c0] sm:$0xff] %vm22_vm3, %v1409_v4 }
 0x179   :  { %1442 = vst.msk [vmem:[%s3079_s4 + $0xc8] sm:$0xff] %vm22_vm3, %v1378_v0  ;;  %v1210_v13 = vld [vmem:[#allocation2 + $0x1c8] sm:$0xff]  ;;  %v1048_v14 = vadd.f32 %v929_v49, %v178_v18 }
 0x17a   :  { %v1278_v16 = vmul.f32 %v2849_v51, %v1210_v13  ;;  %v1179_v19 = vld [vmem:[#allocation2 + $0xd0] sm:$0xff]  ;;  %1144 = vst.msk [vmem:[#allocation2 + $0x1d0] sm:$0xff] %vm22_vm3, %v1079_v7 }
 0x17b   :  { %v1247_v20 = vmul.f32 %v2849_v51, %v1179_v19  ;;  %1113 = vst.msk [vmem:[#allocation2 + $0xd8] sm:$0xff] %vm22_vm3, %v1048_v14  ;;  %v1016_v13 = vpop.f32.mrf.mxu3  ;;  %v184_v14 = vld [vmem:[#allocation2 + $0x108] sm:$0xff] }
 0x17c   :  { %v936_v8 = vpop.f32.mrf.mxu1  ;;  %v1346_v21 = vadd.f32 %v2873_v15, %v1278_v16  ;;  %v839_v22 = vpop.f32.mrf.mxu2 }
 0x17d   :  { %v1315_v6 = vadd.f32 %v2873_v15, %v1247_v20  ;;  %v1009_v24 = vadd.f32 %v1008_v3, %v839_v22 }
 0x17e   :  { %v1410_v23 = vmax.f32 %v1346_v21, 0.0  ;;  %v762_v1 = vpop.f32.mrf.mxu0  ;;  %v213_v21 = vld [vmem:[#allocation2 + $0x1f0] sm:$0xff] }
 0x17f   :  { %v1379_v26 = vmax.f32 %v1315_v6, 0.0  ;;  %v932_v31 = vadd.f32 %v931_v44, %v762_v1  ;;  %v1080_v12 = vadd.f32 %v1009_v24, %v210_v58  ;;  %v182_v24 = vld [vmem:[#allocation2 + $0xf8] sm:$0xff] }
 0x180   :  { %1474 = vst.msk [vmem:[%s3079_s4 + $0x1c8] sm:$0xff] %vm22_vm3, %v1410_v23 }
 0x181   :  { %1443 = vst.msk [vmem:[%s3079_s4 + $0xd0] sm:$0xff] %vm22_vm3, %v1379_v26  ;;  %v1211_v30 = vld [vmem:[#allocation2 + $0x1d0] sm:$0xff]  ;;  %v1049_v33 = vadd.f32 %v932_v31, %v179_v61 }
 0x182   :  { %v1279_v35 = vmul.f32 %v2849_v51, %v1211_v30  ;;  %v1180_v5 = vld [vmem:[#allocation2 + $0xd8] sm:$0xff]  ;;  %1145 = vst.msk [vmem:[#allocation2 + $0x1d8] sm:$0xff] %vm22_vm3, %v1080_v12 }
 0x183   :  { %v1248_v32 = vmul.f32 %v2849_v51, %v1180_v5  ;;  %1114 = vst.msk [vmem:[#allocation2 + $0xe0] sm:$0xff] %vm22_vm3, %v1049_v33 }
 0x184   :  { %v938_v36 = vpop.f32.mrf.mxu1  ;;  %v1347_v39 = vadd.f32 %v2873_v15, %v1279_v35  ;;  %v842_v43 = vpop.f32.mrf.mxu2 }
 0x185   :  { %v1316_v34 = vadd.f32 %v2873_v15, %v1248_v32  ;;  %v1012_v44 = vadd.f32 %v1011_v27, %v842_v43 }
 0x186   :  { %v1411_v25 = vmax.f32 %v1347_v39, 0.0  ;;  %v764_v45 = vpop.f32.mrf.mxu0  ;;  %v1018_v39 = vpop.f32.mrf.mxu3 }
 0x187   :  { %v1380_v46 = vmax.f32 %v1316_v34, 0.0  ;;  %v934_v11 = vadd.f32 %v933_v47, %v764_v45  ;;  %v1081_v48 = vadd.f32 %v1012_v44, %v211_v29  ;;  %v214_v34 = vld [vmem:[#allocation2 + $0x1f8] sm:$0xff] }
 0x188   :  { %1475 = vst.msk [vmem:[%s3079_s4 + $0x1d0] sm:$0xff] %vm22_vm3, %v1411_v25 }
 0x189   :  { %1444 = vst.msk [vmem:[%s3079_s4 + $0xd8] sm:$0xff] %vm22_vm3, %v1380_v46  ;;  %v1212_v50 = vld [vmem:[#allocation2 + $0x1d8] sm:$0xff]  ;;  %v1050_v41 = vadd.f32 %v934_v11, %v180_v42 }
 0x18a   :  { %v1280_v54 = vmul.f32 %v2849_v51, %v1212_v50  ;;  %v1181_v55 = vld [vmem:[#allocation2 + $0xe0] sm:$0xff]  ;;  %1146 = vst.msk [vmem:[#allocation2 + $0x1e0] sm:$0xff] %vm22_vm3, %v1081_v48 }
 0x18b   :  { %v1249_v56 = vmul.f32 %v2849_v51, %v1181_v55  ;;  %1115 = vst.msk [vmem:[#allocation2 + $0xe8] sm:$0xff] %vm22_vm3, %v1050_v41 }
 0x18c   :  { %v941_v38 = vpop.f32.mrf.mxu1  ;;  %v1348_v53 = vadd.f32 %v2873_v15, %v1280_v54  ;;  %v844_v47 = vpop.f32.mrf.mxu2 }
 0x18d   :  { %v942_v17 = vadd.f32 %v941_v38, %v2296_v10  ;;  %v1317_v60 = vadd.f32 %v2873_v15, %v1249_v56  ;;  %v1014_v37 = vadd.f32 %v1013_v9, %v844_v47 }
 0x18e   :  { %v1412_v63 = vmax.f32 %v1348_v53, 0.0  ;;  %v767_v3 = vpop.f32.mrf.mxu0 }
 0x18f   :  { %v1053_v52 = vadd.f32 %v942_v17, %v183_v57  ;;  %v1381_v4 = vmax.f32 %v1317_v60, 0.0  ;;  %v937_v40 = vadd.f32 %v936_v8, %v767_v3  ;;  %v1082_v18 = vadd.f32 %v1014_v37, %v212_v62 }
 0x190   :  { %1476 = vst.msk [vmem:[%s3079_s4 + $0x1d8] sm:$0xff] %vm22_vm3, %v1412_v63 }
 0x191   :  { %1445 = vst.msk [vmem:[%s3079_s4 + $0xe0] sm:$0xff] %vm22_vm3, %v1381_v4  ;;  %v1213_v10 = vld [vmem:[#allocation2 + $0x1e0] sm:$0xff]  ;;  %v1051_v59 = vadd.f32 %v937_v40, %v181_v2 }
 0x192   :  { %v1281_v0 = vmul.f32 %v2849_v51, %v1213_v10  ;;  %v1182_v49 = vld [vmem:[#allocation2 + $0xe8] sm:$0xff]  ;;  %1118 = vst.msk [vmem:[#allocation2 + $0x100] sm:$0xff] %vm22_vm3, %v1053_v52 }
 0x193   :  { %v1250_v7 = vmul.f32 %v2849_v51, %v1182_v49  ;;  %1147 = vst.msk [vmem:[#allocation2 + $0x1e8] sm:$0xff] %vm22_vm3, %v1082_v18 }
 0x194   :  { %v943_v16 = vpop.f32.mrf.mxu1  ;;  %v1349_v19 = vadd.f32 %v2873_v15, %v1281_v0  ;;  %1116 = vst.msk [vmem:[#allocation2 + $0xf0] sm:$0xff] %vm22_vm3, %v1051_v59  ;;  %v847_v6 = vpop.f32.mrf.mxu2 }
 0x195   :  { %v944_v20 = vadd.f32 %v943_v16, %v2350_v28  ;;  %v1318_v8 = vadd.f32 %v2873_v15, %v1250_v7  ;;  %v1017_v23 = vadd.f32 %v1016_v13, %v847_v6 }
 0x196   :  { %v1413_v58 = vmax.f32 %v1349_v19, 0.0  ;;  %v769_v61 = vpop.f32.mrf.mxu0 }
 0x197   :  { %v1054_v22 = vadd.f32 %v944_v20, %v184_v14  ;;  %v1382_v1 = vmax.f32 %v1318_v8, 0.0  ;;  %v939_v26 = vadd.f32 %v938_v36, %v769_v61  ;;  %v1083_v27 = vadd.f32 %v1017_v23, %v213_v21 }
 0x198   :  { %1477 = vst.msk [vmem:[%s3079_s4 + $0x1e0] sm:$0xff] %vm22_vm3, %v1413_v58 }
 0x199   :  { %1446 = vst.msk [vmem:[%s3079_s4 + $0xe8] sm:$0xff] %vm22_vm3, %v1382_v1  ;;  %v1185_v28 = vld [vmem:[#allocation2 + $0x100] sm:$0xff]  ;;  %v1052_v31 = vadd.f32 %v939_v26, %v182_v24 }
 0x19a   :  { %v1253_v12 = vmul.f32 %v2849_v51, %v1185_v28  ;;  %v1214_v30 = vld [vmem:[#allocation2 + $0x1e8] sm:$0xff]  ;;  %1119 = vst.msk [vmem:[#allocation2 + $0x108] sm:$0xff] %vm22_vm3, %v1054_v22 }
 0x19b   :  { %v1282_v33 = vmul.f32 %v2849_v51, %v1214_v30  ;;  %v1183_v35 = vld [vmem:[#allocation2 + $0xf0] sm:$0xff]  ;;  %1148 = vst.msk [vmem:[#allocation2 + $0x1f0] sm:$0xff] %vm22_vm3, %v1083_v27 }
 0x19c   :  { %v1321_v5 = vadd.f32 %v2873_v15, %v1253_v12  ;;  %v1251_v32 = vmul.f32 %v2849_v51, %v1183_v35  ;;  %1117 = vst.msk [vmem:[#allocation2 + $0xf8] sm:$0xff] %vm22_vm3, %v1052_v31  ;;  %v849_v29 = vpop.f32.mrf.mxu2 }
 0x19d   :  { %v1350_v36 = vadd.f32 %v2873_v15, %v1282_v33  ;;  %v1019_v44 = vadd.f32 %v1018_v39, %v849_v29 }
 0x19e   :  { %v1385_v43 = vmax.f32 %v1321_v5, 0.0  ;;  %v1319_v25 = vadd.f32 %v2873_v15, %v1251_v32 }
 0x19f   :  { %v1414_v42 = vmax.f32 %v1350_v36, 0.0  ;;  %v1084_v46 = vadd.f32 %v1019_v44, %v214_v34 }
 0x1a0   :  { %1449 = vst.msk [vmem:[%s3079_s4 + $0x100] sm:$0xff] %vm22_vm3, %v1385_v43  ;;  %v1383_v45 = vmax.f32 %v1319_v25, 0.0 }
 0x1a1   :  { %1478 = vst.msk [vmem:[%s3079_s4 + $0x1e8] sm:$0xff] %vm22_vm3, %v1414_v42  ;;  %v1186_v11 = vld [vmem:[#allocation2 + $0x108] sm:$0xff] }
 0x1a2   :  { %1447 = vst.msk [vmem:[%s3079_s4 + $0xf0] sm:$0xff] %vm22_vm3, %v1383_v45  ;;  %v1254_v48 = vmul.f32 %v2849_v51, %v1186_v11  ;;  %v1215_v50 = vld [vmem:[#allocation2 + $0x1f0] sm:$0xff] }
 0x1a3   :  { %v1283_v9 = vmul.f32 %v2849_v51, %v1215_v50  ;;  %v1184_v41 = vld [vmem:[#allocation2 + $0xf8] sm:$0xff]  ;;  %1149 = vst.msk [vmem:[#allocation2 + $0x1f8] sm:$0xff] %vm22_vm3, %v1084_v46 }
 0x1a4   :  { %v1322_v54 = vadd.f32 %v2873_v15, %v1254_v48  ;;  %v1252_v55 = vmul.f32 %v2849_v51, %v1184_v41 }
 0x1a5   :  { %v1351_v56 = vadd.f32 %v2873_v15, %v1283_v9 }
 0x1a6   :  { %v1386_v57 = vmax.f32 %v1322_v54, 0.0  ;;  %v1320_v38 = vadd.f32 %v2873_v15, %v1252_v55 }
 0x1a7   :  { %v1415_v53 = vmax.f32 %v1351_v56, 0.0 }
 0x1a8   :  { %1450 = vst.msk [vmem:[%s3079_s4 + $0x108] sm:$0xff] %vm22_vm3, %v1386_v57  ;;  %v1384_v17 = vmax.f32 %v1320_v38, 0.0 }
 0x1a9   :  { %1479 = vst.msk [vmem:[%s3079_s4 + $0x1f0] sm:$0xff] %vm22_vm3, %v1415_v53 }
 0x1aa   :  { %1448 = vst.msk [vmem:[%s3079_s4 + $0xf8] sm:$0xff] %vm22_vm3, %v1384_v17  ;;  %v1216_v60 = vld [vmem:[#allocation2 + $0x1f8] sm:$0xff] }
 0x1ab   :  { %v1284_v62 = vmul.f32 %v2849_v51, %v1216_v60 }
 0x1ad   :  { %v1352_v47 = vadd.f32 %v2873_v15, %v1284_v62 }
 0x1af   :  { %v1416_v63 = vmax.f32 %v1352_v47, 0.0 }
 0x1b1   :  { %1480 = vst.msk [vmem:[%s3079_s4 + $0x1f8] sm:$0xff] %vm22_vm3, %v1416_v63 }

</bundles_post_ra>
